<compile_context>
chip_gen: v6e
topology: v6e:2x2x1
jax: 0.10.0
libtpu: 0.0.40
codegen_flags: <defaults>
</compile_context>

<pallas_src>
import functools

import jax
import jax.numpy as jnp
from jax.experimental import pallas as pl
from jax.experimental.pallas import tpu as pltpu


def _round_up(x, m):
    return ((x + m - 1) // m) * m


def ae_forward_kernel(x_ref, *refs, compute_dtype):
    """refs = (w0, b0, w1, b1, ..., w7, b7, out_ref).

    Weights arrive already cast to `compute_dtype` (host-side); biases are f32.
    """
    out_ref = refs[-1]
    params = refs[:-1]
    n_layers = len(params) // 2

    h = x_ref[...].astype(compute_dtype)
    for li in range(n_layers):
        w = params[2 * li][...]          # compute_dtype (no per-step repack)
        b = params[2 * li + 1][...]      # float32, broadcast over rows
        acc = jnp.dot(h, w, preferred_element_type=jnp.float32) + b
        if li != n_layers - 1:           # final decoder Linear has no ReLU
            h = jnp.maximum(acc, 0.0).astype(compute_dtype)
        else:
            h = acc
        # Dropout layers are identity at inference time.
    out_ref[...] = h.astype(out_ref.dtype)


def make_ae_params(key, input_dim, hidden_sizes):
    """Deterministic params for encoder+decoder, stored as (in, out) + (1, out).

    Equivalent to torch Linear with W = W_torch.T: y = x @ W + b.
    """
    dims_enc = [input_dim] + list(hidden_sizes)            # D->128->64->32->16
    dims_dec = list(reversed(hidden_sizes)) + [input_dim]  # 16->32->64->128->D
    layer_dims = list(zip(dims_enc[:-1], dims_enc[1:])) + \
                 list(zip(dims_dec[:-1], dims_dec[1:]))
    params = []
    for (fan_in, fan_out) in layer_dims:
        key, kw, kb = jax.random.split(key, 3)
        bound = 1.0 / jnp.sqrt(jnp.float32(fan_in))
        w = jax.random.uniform(kw, (fan_in, fan_out), jnp.float32, -bound, bound)
        b = jax.random.uniform(kb, (1, fan_out), jnp.float32, -bound, bound)
        params += [w, b]
    return params


@functools.partial(jax.jit,
                   static_argnames=("tile_b", "compute_dtype", "out_dtype"))
def ae_forward(x, params, *, tile_b=2048, compute_dtype=jnp.bfloat16,
               out_dtype=None):
    B, D = x.shape
    n_layers = len(params) // 2
    out_dtype = x.dtype if out_dtype is None else out_dtype

    # --- Batch tiling -------------------------------------------------------
    # (8,128) rule: the sublane (second-to-last) block dim must be a multiple
    # of 8; the lane dim stays the FULL feature extent D (no pad-to-128).
    tile_b = max(8, (int(tile_b) // 8) * 8)
    B8 = _round_up(B, 8)
    tile = min(tile_b, B8)
    # v7x: the "parallel" batch axis is what shards across the 2 TensorCores;
    # keep the grid length >= 2 whenever the batch is big enough to split.
    if tile == B8 and B8 >= 512:
        tile = _round_up(B8 // 2, 8)
    B_pad = _round_up(B, tile)
    grid = (B_pad // tile,)

    # Only the batch dim is (rarely) padded; feature dim is untouched.
    x_p = jnp.pad(x, ((0, B_pad - B), (0, 0))) if B_pad != B else x

    # Cast weights to the MXU input dtype once on the host; biases stay f32.
    params_p = []
    for li in range(n_layers):
        params_p.append(params[2 * li].astype(compute_dtype))
        params_p.append(params[2 * li + 1].astype(jnp.float32))

    x_spec = pl.BlockSpec((tile, D), lambda i: (i, 0))
    out_spec = pl.BlockSpec((tile, D), lambda i: (i, 0))
    # Parameters are grid-invariant (constant index_map): single-buffer them.
    param_specs = [
        pl.BlockSpec(p.shape, lambda i: (0, 0), pipeline_mode=pl.Buffered(1))
        for p in params_p
    ]

    # Advisory cost hint for XLA scheduling around the custom call.
    flops = 2 * B_pad * sum(
        int(params_p[2 * li].shape[0]) * int(params_p[2 * li].shape[1])
        for li in range(n_layers))
    param_bytes = sum(int(p.size) * p.dtype.itemsize for p in params_p)
    bytes_accessed = (B_pad * D * x.dtype.itemsize
                      + B_pad * D * jnp.dtype(out_dtype).itemsize
                      + param_bytes)

    out = pl.pallas_call(
        functools.partial(ae_forward_kernel, compute_dtype=compute_dtype),
        out_shape=jax.ShapeDtypeStruct((B_pad, D), out_dtype),
        grid_spec=pltpu.PrefetchScalarGridSpec(
            num_scalar_prefetch=0,
            grid=grid,
            in_specs=[x_spec] + param_specs,
            out_specs=out_spec,
        ),
        compiler_params=pltpu.CompilerParams(
            dimension_semantics=("parallel",),
        ),
        cost_estimate=pl.CostEstimate(
            flops=flops, transcendentals=0, bytes_accessed=bytes_accessed),
    )(x_p, *params_p)

    return out if B_pad == B else out[:B]


def ae_forward_ref(x, params, compute_dtype=jnp.bfloat16):
    """Pure-JAX reference with identical (bf16-in, f32-acc) math."""
    h = x
    n_layers = len(params) // 2
    for li in range(n_layers):
        w = params[2 * li].astype(compute_dtype)
        b = params[2 * li + 1].astype(jnp.float32)
        h = jnp.dot(h.astype(compute_dtype), w,
                    preferred_element_type=jnp.float32) + b
        if li != n_layers - 1:
            h = jnp.maximum(h, 0.0)
    return h.astype(x.dtype)


if __name__ == "__main__":
    key = jax.random.PRNGKey(0)
    k_params, k_x = jax.random.split(key)

    input_dim = 64
    hidden_sizes = [128, 64, 32, 16]   # default network_architecture
    batch = 512                        # -> 2 grid tiles of 256 rows, no padding

    params = make_ae_params(k_params, input_dim, hidden_sizes)
    x = jax.random.normal(k_x, (batch, input_dim), jnp.float32)

    recon = ae_forward(x, params)
    recon = jax.block_until_ready(recon)

    ref = ae_forward_ref(x, params)
    assert recon.shape == (batch, input_dim)
    assert jnp.allclose(recon, ref, atol=3e-3, rtol=3e-3), "mismatch vs reference"

    print("KERNEL_OK")
</pallas_src>

<mosaic_0001>
module attributes {stable_mosaic.version = 11 : i64} {
  func.func @ae_forward_kernel(%arg0: i32, %arg1: memref<256x64xf32, #tpu.memory_space<vmem>>, %arg2: memref<64x128xbf16, #tpu.memory_space<vmem>>, %arg3: memref<1x128xf32, #tpu.memory_space<vmem>>, %arg4: memref<128x64xbf16, #tpu.memory_space<vmem>>, %arg5: memref<1x64xf32, #tpu.memory_space<vmem>>, %arg6: memref<64x32xbf16, #tpu.memory_space<vmem>>, %arg7: memref<1x32xf32, #tpu.memory_space<vmem>>, %arg8: memref<32x16xbf16, #tpu.memory_space<vmem>>, %arg9: memref<1x16xf32, #tpu.memory_space<vmem>>, %arg10: memref<16x32xbf16, #tpu.memory_space<vmem>>, %arg11: memref<1x32xf32, #tpu.memory_space<vmem>>, %arg12: memref<32x64xbf16, #tpu.memory_space<vmem>>, %arg13: memref<1x64xf32, #tpu.memory_space<vmem>>, %arg14: memref<64x128xbf16, #tpu.memory_space<vmem>>, %arg15: memref<1x128xf32, #tpu.memory_space<vmem>>, %arg16: memref<128x64xbf16, #tpu.memory_space<vmem>>, %arg17: memref<1x64xf32, #tpu.memory_space<vmem>>, %arg18: memref<256x64xf32, #tpu.memory_space<vmem>>) attributes {dimension_semantics = [#tpu.dimension_semantics<parallel>], iteration_bounds = array<i64: 2>, scalar_prefetch = 0 : i64, scratch_operands = 0 : i64, tpu.core_type = #tpu.core_type<tc>, window_params = [{transform_indices = @transform_0, window_bounds = array<i64: 256, 64>}, {pipeline_mode = #tpu.pipeline_mode<synchronous>, transform_indices = @transform_1, window_bounds = array<i64: 64, 128>}, {pipeline_mode = #tpu.pipeline_mode<synchronous>, transform_indices = @transform_2, window_bounds = array<i64: 1, 128>}, {pipeline_mode = #tpu.pipeline_mode<synchronous>, transform_indices = @transform_3, window_bounds = array<i64: 128, 64>}, {pipeline_mode = #tpu.pipeline_mode<synchronous>, transform_indices = @transform_4, window_bounds = array<i64: 1, 64>}, {pipeline_mode = #tpu.pipeline_mode<synchronous>, transform_indices = @transform_5, window_bounds = array<i64: 64, 32>}, {pipeline_mode = #tpu.pipeline_mode<synchronous>, transform_indices = @transform_6, window_bounds = array<i64: 1, 32>}, {pipeline_mode = #tpu.pipeline_mode<synchronous>, transform_indices = @transform_7, window_bounds = array<i64: 32, 16>}, {pipeline_mode = #tpu.pipeline_mode<synchronous>, transform_indices = @transform_8, window_bounds = array<i64: 1, 16>}, {pipeline_mode = #tpu.pipeline_mode<synchronous>, transform_indices = @transform_9, window_bounds = array<i64: 16, 32>}, {pipeline_mode = #tpu.pipeline_mode<synchronous>, transform_indices = @transform_10, window_bounds = array<i64: 1, 32>}, {pipeline_mode = #tpu.pipeline_mode<synchronous>, transform_indices = @transform_11, window_bounds = array<i64: 32, 64>}, {pipeline_mode = #tpu.pipeline_mode<synchronous>, transform_indices = @transform_12, window_bounds = array<i64: 1, 64>}, {pipeline_mode = #tpu.pipeline_mode<synchronous>, transform_indices = @transform_13, window_bounds = array<i64: 64, 128>}, {pipeline_mode = #tpu.pipeline_mode<synchronous>, transform_indices = @transform_14, window_bounds = array<i64: 1, 128>}, {pipeline_mode = #tpu.pipeline_mode<synchronous>, transform_indices = @transform_15, window_bounds = array<i64: 128, 64>}, {pipeline_mode = #tpu.pipeline_mode<synchronous>, transform_indices = @transform_16, window_bounds = array<i64: 1, 64>}, {transform_indices = @transform_17, window_bounds = array<i64: 256, 64>}]} {
    %c0 = arith.constant 0 : index
    %c0_0 = arith.constant 0 : index
    %0 = vector.load %arg1[%c0, %c0_0] : memref<256x64xf32, #tpu.memory_space<vmem>>, vector<256x64xf32>
    %1 = arith.truncf %0 : vector<256x64xf32> to vector<256x64xbf16>
    %c0_1 = arith.constant 0 : index
    %c0_2 = arith.constant 0 : index
    %2 = vector.load %arg2[%c0_1, %c0_2] : memref<64x128xbf16, #tpu.memory_space<vmem>>, vector<64x128xbf16>
    %c0_3 = arith.constant 0 : index
    %c0_4 = arith.constant 0 : index
    %3 = vector.load %arg3[%c0_3, %c0_4] : memref<1x128xf32, #tpu.memory_space<vmem>>, vector<1x128xf32>
    %cst = arith.constant dense<0.000000e+00> : vector<256x128xf32>
    %4 = tpu.matmul %1, %2, %cst {dimension_numbers = #tpu.dot_dimension_numbers<[1], [0], [0], [1], [0, 0, 1, 1], [], []>} : vector<256x64xbf16>, vector<64x128xbf16>, vector<256x128xf32> -> vector<256x128xf32>
    %5 = vector.broadcast %3 : vector<1x128xf32> to vector<256x128xf32>
    %6 = arith.addf %4, %5 : vector<256x128xf32>
    %cst_5 = arith.constant 0.000000e+00 : f32
    %7 = vector.broadcast %cst_5 : f32 to vector<256x128xf32>
    %8 = arith.maximumf %6, %7 : vector<256x128xf32>
    %9 = arith.truncf %8 : vector<256x128xf32> to vector<256x128xbf16>
    %c0_6 = arith.constant 0 : index
    %c0_7 = arith.constant 0 : index
    %10 = vector.load %arg4[%c0_6, %c0_7] : memref<128x64xbf16, #tpu.memory_space<vmem>>, vector<128x64xbf16>
    %c0_8 = arith.constant 0 : index
    %c0_9 = arith.constant 0 : index
    %11 = vector.load %arg5[%c0_8, %c0_9] : memref<1x64xf32, #tpu.memory_space<vmem>>, vector<1x64xf32>
    %cst_10 = arith.constant dense<0.000000e+00> : vector<256x64xf32>
    %12 = tpu.matmul %9, %10, %cst_10 {dimension_numbers = #tpu.dot_dimension_numbers<[1], [0], [0], [1], [0, 0, 1, 1], [], []>} : vector<256x128xbf16>, vector<128x64xbf16>, vector<256x64xf32> -> vector<256x64xf32>
    %13 = vector.broadcast %11 : vector<1x64xf32> to vector<256x64xf32>
    %14 = arith.addf %12, %13 : vector<256x64xf32>
    %cst_11 = arith.constant 0.000000e+00 : f32
    %15 = vector.broadcast %cst_11 : f32 to vector<256x64xf32>
    %16 = arith.maximumf %14, %15 : vector<256x64xf32>
    %17 = arith.truncf %16 : vector<256x64xf32> to vector<256x64xbf16>
    %c0_12 = arith.constant 0 : index
    %c0_13 = arith.constant 0 : index
    %18 = vector.load %arg6[%c0_12, %c0_13] : memref<64x32xbf16, #tpu.memory_space<vmem>>, vector<64x32xbf16>
    %c0_14 = arith.constant 0 : index
    %c0_15 = arith.constant 0 : index
    %19 = vector.load %arg7[%c0_14, %c0_15] : memref<1x32xf32, #tpu.memory_space<vmem>>, vector<1x32xf32>
    %cst_16 = arith.constant dense<0.000000e+00> : vector<256x32xf32>
    %20 = tpu.matmul %17, %18, %cst_16 {dimension_numbers = #tpu.dot_dimension_numbers<[1], [0], [0], [1], [0, 0, 1, 1], [], []>} : vector<256x64xbf16>, vector<64x32xbf16>, vector<256x32xf32> -> vector<256x32xf32>
    %21 = vector.broadcast %19 : vector<1x32xf32> to vector<256x32xf32>
    %22 = arith.addf %20, %21 : vector<256x32xf32>
    %cst_17 = arith.constant 0.000000e+00 : f32
    %23 = vector.broadcast %cst_17 : f32 to vector<256x32xf32>
    %24 = arith.maximumf %22, %23 : vector<256x32xf32>
    %25 = arith.truncf %24 : vector<256x32xf32> to vector<256x32xbf16>
    %c0_18 = arith.constant 0 : index
    %c0_19 = arith.constant 0 : index
    %26 = vector.load %arg8[%c0_18, %c0_19] : memref<32x16xbf16, #tpu.memory_space<vmem>>, vector<32x16xbf16>
    %c0_20 = arith.constant 0 : index
    %c0_21 = arith.constant 0 : index
    %27 = vector.load %arg9[%c0_20, %c0_21] : memref<1x16xf32, #tpu.memory_space<vmem>>, vector<1x16xf32>
    %cst_22 = arith.constant dense<0.000000e+00> : vector<256x16xf32>
    %28 = tpu.matmul %25, %26, %cst_22 {dimension_numbers = #tpu.dot_dimension_numbers<[1], [0], [0], [1], [0, 0, 1, 1], [], []>} : vector<256x32xbf16>, vector<32x16xbf16>, vector<256x16xf32> -> vector<256x16xf32>
    %29 = vector.broadcast %27 : vector<1x16xf32> to vector<256x16xf32>
    %30 = arith.addf %28, %29 : vector<256x16xf32>
    %cst_23 = arith.constant 0.000000e+00 : f32
    %31 = vector.broadcast %cst_23 : f32 to vector<256x16xf32>
    %32 = arith.maximumf %30, %31 : vector<256x16xf32>
    %33 = arith.truncf %32 : vector<256x16xf32> to vector<256x16xbf16>
    %c0_24 = arith.constant 0 : index
    %c0_25 = arith.constant 0 : index
    %34 = vector.load %arg10[%c0_24, %c0_25] : memref<16x32xbf16, #tpu.memory_space<vmem>>, vector<16x32xbf16>
    %c0_26 = arith.constant 0 : index
    %c0_27 = arith.constant 0 : index
    %35 = vector.load %arg11[%c0_26, %c0_27] : memref<1x32xf32, #tpu.memory_space<vmem>>, vector<1x32xf32>
    %cst_28 = arith.constant dense<0.000000e+00> : vector<256x32xf32>
    %36 = tpu.matmul %33, %34, %cst_28 {dimension_numbers = #tpu.dot_dimension_numbers<[1], [0], [0], [1], [0, 0, 1, 1], [], []>} : vector<256x16xbf16>, vector<16x32xbf16>, vector<256x32xf32> -> vector<256x32xf32>
    %37 = vector.broadcast %35 : vector<1x32xf32> to vector<256x32xf32>
    %38 = arith.addf %36, %37 : vector<256x32xf32>
    %cst_29 = arith.constant 0.000000e+00 : f32
    %39 = vector.broadcast %cst_29 : f32 to vector<256x32xf32>
    %40 = arith.maximumf %38, %39 : vector<256x32xf32>
    %41 = arith.truncf %40 : vector<256x32xf32> to vector<256x32xbf16>
    %c0_30 = arith.constant 0 : index
    %c0_31 = arith.constant 0 : index
    %42 = vector.load %arg12[%c0_30, %c0_31] : memref<32x64xbf16, #tpu.memory_space<vmem>>, vector<32x64xbf16>
    %c0_32 = arith.constant 0 : index
    %c0_33 = arith.constant 0 : index
    %43 = vector.load %arg13[%c0_32, %c0_33] : memref<1x64xf32, #tpu.memory_space<vmem>>, vector<1x64xf32>
    %cst_34 = arith.constant dense<0.000000e+00> : vector<256x64xf32>
    %44 = tpu.matmul %41, %42, %cst_34 {dimension_numbers = #tpu.dot_dimension_numbers<[1], [0], [0], [1], [0, 0, 1, 1], [], []>} : vector<256x32xbf16>, vector<32x64xbf16>, vector<256x64xf32> -> vector<256x64xf32>
    %45 = vector.broadcast %43 : vector<1x64xf32> to vector<256x64xf32>
    %46 = arith.addf %44, %45 : vector<256x64xf32>
    %cst_35 = arith.constant 0.000000e+00 : f32
    %47 = vector.broadcast %cst_35 : f32 to vector<256x64xf32>
    %48 = arith.maximumf %46, %47 : vector<256x64xf32>
    %49 = arith.truncf %48 : vector<256x64xf32> to vector<256x64xbf16>
    %c0_36 = arith.constant 0 : index
    %c0_37 = arith.constant 0 : index
    %50 = vector.load %arg14[%c0_36, %c0_37] : memref<64x128xbf16, #tpu.memory_space<vmem>>, vector<64x128xbf16>
    %c0_38 = arith.constant 0 : index
    %c0_39 = arith.constant 0 : index
    %51 = vector.load %arg15[%c0_38, %c0_39] : memref<1x128xf32, #tpu.memory_space<vmem>>, vector<1x128xf32>
    %cst_40 = arith.constant dense<0.000000e+00> : vector<256x128xf32>
    %52 = tpu.matmul %49, %50, %cst_40 {dimension_numbers = #tpu.dot_dimension_numbers<[1], [0], [0], [1], [0, 0, 1, 1], [], []>} : vector<256x64xbf16>, vector<64x128xbf16>, vector<256x128xf32> -> vector<256x128xf32>
    %53 = vector.broadcast %51 : vector<1x128xf32> to vector<256x128xf32>
    %54 = arith.addf %52, %53 : vector<256x128xf32>
    %cst_41 = arith.constant 0.000000e+00 : f32
    %55 = vector.broadcast %cst_41 : f32 to vector<256x128xf32>
    %56 = arith.maximumf %54, %55 : vector<256x128xf32>
    %57 = arith.truncf %56 : vector<256x128xf32> to vector<256x128xbf16>
    %c0_42 = arith.constant 0 : index
    %c0_43 = arith.constant 0 : index
    %58 = vector.load %arg16[%c0_42, %c0_43] : memref<128x64xbf16, #tpu.memory_space<vmem>>, vector<128x64xbf16>
    %c0_44 = arith.constant 0 : index
    %c0_45 = arith.constant 0 : index
    %59 = vector.load %arg17[%c0_44, %c0_45] : memref<1x64xf32, #tpu.memory_space<vmem>>, vector<1x64xf32>
    %cst_46 = arith.constant dense<0.000000e+00> : vector<256x64xf32>
    %60 = tpu.matmul %57, %58, %cst_46 {dimension_numbers = #tpu.dot_dimension_numbers<[1], [0], [0], [1], [0, 0, 1, 1], [], []>} : vector<256x128xbf16>, vector<128x64xbf16>, vector<256x64xf32> -> vector<256x64xf32>
    %61 = vector.broadcast %59 : vector<1x64xf32> to vector<256x64xf32>
    %62 = arith.addf %60, %61 : vector<256x64xf32>
    %c0_47 = arith.constant 0 : index
    %c0_48 = arith.constant 0 : index
    %63 = vector.load %arg18[%c0_47, %c0_48] : memref<256x64xf32, #tpu.memory_space<vmem>>, vector<256x64xf32>
    tpu.vector_store %arg18[%c0_47, %c0_48], %62 {strides = array<i32>} : memref<256x64xf32, #tpu.memory_space<vmem>>, vector<256x64xf32>,
    return
  }
  func.func @transform_0(%arg0: i32) -> (i32, i32) {
    %c0_i32 = arith.constant 0 : i32
    %c0_i32_0 = arith.constant 0 : i32
    return %arg0, %c0_i32 : i32, i32
  }
  func.func @transform_1(%arg0: i32) -> (i32, i32) {
    %c0_i32 = arith.constant 0 : i32
    %c0_i32_0 = arith.constant 0 : i32
    %c0_i32_1 = arith.constant 0 : i32
    return %c0_i32, %c0_i32_0 : i32, i32
  }
  func.func @transform_2(%arg0: i32) -> (i32, i32) {
    %c0_i32 = arith.constant 0 : i32
    %c0_i32_0 = arith.constant 0 : i32
    %c0_i32_1 = arith.constant 0 : i32
    return %c0_i32, %c0_i32_0 : i32, i32
  }
  func.func @transform_3(%arg0: i32) -> (i32, i32) {
    %c0_i32 = arith.constant 0 : i32
    %c0_i32_0 = arith.constant 0 : i32
    %c0_i32_1 = arith.constant 0 : i32
    return %c0_i32, %c0_i32_0 : i32, i32
  }
  func.func @transform_4(%arg0: i32) -> (i32, i32) {
    %c0_i32 = arith.constant 0 : i32
    %c0_i32_0 = arith.constant 0 : i32
    %c0_i32_1 = arith.constant 0 : i32
    return %c0_i32, %c0_i32_0 : i32, i32
  }
  func.func @transform_5(%arg0: i32) -> (i32, i32) {
    %c0_i32 = arith.constant 0 : i32
    %c0_i32_0 = arith.constant 0 : i32
    %c0_i32_1 = arith.constant 0 : i32
    return %c0_i32, %c0_i32_0 : i32, i32
  }
  func.func @transform_6(%arg0: i32) -> (i32, i32) {
    %c0_i32 = arith.constant 0 : i32
    %c0_i32_0 = arith.constant 0 : i32
    %c0_i32_1 = arith.constant 0 : i32
    return %c0_i32, %c0_i32_0 : i32, i32
  }
  func.func @transform_7(%arg0: i32) -> (i32, i32) {
    %c0_i32 = arith.constant 0 : i32
    %c0_i32_0 = arith.constant 0 : i32
    %c0_i32_1 = arith.constant 0 : i32
    return %c0_i32, %c0_i32_0 : i32, i32
  }
  func.func @transform_8(%arg0: i32) -> (i32, i32) {
    %c0_i32 = arith.constant 0 : i32
    %c0_i32_0 = arith.constant 0 : i32
    %c0_i32_1 = arith.constant 0 : i32
    return %c0_i32, %c0_i32_0 : i32, i32
  }
  func.func @transform_9(%arg0: i32) -> (i32, i32) {
    %c0_i32 = arith.constant 0 : i32
    %c0_i32_0 = arith.constant 0 : i32
    %c0_i32_1 = arith.constant 0 : i32
    return %c0_i32, %c0_i32_0 : i32, i32
  }
  func.func @transform_10(%arg0: i32) -> (i32, i32) {
    %c0_i32 = arith.constant 0 : i32
    %c0_i32_0 = arith.constant 0 : i32
    %c0_i32_1 = arith.constant 0 : i32
    return %c0_i32, %c0_i32_0 : i32, i32
  }
  func.func @transform_11(%arg0: i32) -> (i32, i32) {
    %c0_i32 = arith.constant 0 : i32
    %c0_i32_0 = arith.constant 0 : i32
    %c0_i32_1 = arith.constant 0 : i32
    return %c0_i32, %c0_i32_0 : i32, i32
  }
  func.func @transform_12(%arg0: i32) -> (i32, i32) {
    %c0_i32 = arith.constant 0 : i32
    %c0_i32_0 = arith.constant 0 : i32
    %c0_i32_1 = arith.constant 0 : i32
    return %c0_i32, %c0_i32_0 : i32, i32
  }
  func.func @transform_13(%arg0: i32) -> (i32, i32) {
    %c0_i32 = arith.constant 0 : i32
    %c0_i32_0 = arith.constant 0 : i32
    %c0_i32_1 = arith.constant 0 : i32
    return %c0_i32, %c0_i32_0 : i32, i32
  }
  func.func @transform_14(%arg0: i32) -> (i32, i32) {
    %c0_i32 = arith.constant 0 : i32
    %c0_i32_0 = arith.constant 0 : i32
    %c0_i32_1 = arith.constant 0 : i32
    return %c0_i32, %c0_i32_0 : i32, i32
  }
  func.func @transform_15(%arg0: i32) -> (i32, i32) {
    %c0_i32 = arith.constant 0 : i32
    %c0_i32_0 = arith.constant 0 : i32
    %c0_i32_1 = arith.constant 0 : i32
    return %c0_i32, %c0_i32_0 : i32, i32
  }
  func.func @transform_16(%arg0: i32) -> (i32, i32) {
    %c0_i32 = arith.constant 0 : i32
    %c0_i32_0 = arith.constant 0 : i32
    %c0_i32_1 = arith.constant 0 : i32
    return %c0_i32, %c0_i32_0 : i32, i32
  }
  func.func @transform_17(%arg0: i32) -> (i32, i32) {
    %c0_i32 = arith.constant 0 : i32
    %c0_i32_0 = arith.constant 0 : i32
    return %arg0, %c0_i32 : i32, i32
  }
}

</mosaic_0001>

<bundles_post_ra>
// kernel: ae_forward.1
= control target key start
LH: loop header
LB: loop body
LE: loop exit
PB: predicated region body
PF: predicated region fallthrough
CT: control target
= control target key end

     0   :  { %s3698_s24 = smov 0   ;;  %s4313_s0 = inlined_call_operand.vmem [shape: f32[512,64], index: 0, kind: input, shape index: {}]   ;;  %s4314_s1 = inlined_call_operand.vmem [shape: bf16[64,128], index: 1, kind: input, shape index: {}]   ;;  %s4315_s2 = inlined_call_operand.vmem [shape: f32[1,128], index: 2, kind: input, shape index: {}]   ;;  %s4316_s3 = inlined_call_operand.vmem [shape: bf16[128,64], index: 3, kind: input, shape index: {}]   ;;  %s4317_s4 = inlined_call_operand.vmem [shape: f32[1,64], index: 4, kind: input, shape index: {}]   ;;  %s4318_s5 = inlined_call_operand.vmem [shape: bf16[64,32], index: 5, kind: input, shape index: {}]   ;;  %s4319_s6 = inlined_call_operand.vmem [shape: f32[1,32], index: 6, kind: input, shape index: {}]   ;;  %s4320_s7 = inlined_call_operand.vmem [shape: bf16[32,16], index: 7, kind: input, shape index: {}]   ;;  %s4321_s8 = inlined_call_operand.vmem [shape: f32[1,16], index: 8, kind: input, shape index: {}]   ;;  %s4322_s9 = inlined_call_operand.vmem [shape: bf16[16,32], index: 9, kind: input, shape index: {}]   ;;  %s4323_s10 = inlined_call_operand.vmem [shape: f32[1,32], index: 10, kind: input, shape index: {}]   ;;  %s4324_s11 = inlined_call_operand.vmem [shape: bf16[32,64], index: 11, kind: input, shape index: {}]   ;;  %s4325_s12 = inlined_call_operand.vmem [shape: f32[1,64], index: 12, kind: input, shape index: {}]   ;;  %s4326_s13 = inlined_call_operand.vmem [shape: bf16[64,128], index: 13, kind: input, shape index: {}]   ;;  %s4327_s14 = inlined_call_operand.vmem [shape: f32[1,128], index: 14, kind: input, shape index: {}]   ;;  %s4328_s15 = inlined_call_operand.vmem [shape: bf16[128,64], index: 15, kind: input, shape index: {}]   ;;  %s4329_s16 = inlined_call_operand.vmem [shape: f32[1,64], index: 16, kind: input, shape index: {}]   ;;  %s4330_s17 = inlined_call_operand.vmem [shape: f32[512,64], index: 17, kind: output, shape index: {}]  }
   0x1   :  { %4332 = sst [smem:[#allocation2_spill]] %s4313_s0 }
   0x2   :  { %4333 = sst [smem:[#allocation3_spill]] %s4314_s1 }
   0x3 LB: > { %s2924_s25 = sadd.s32 4294967295, %s3606_s24   ;;  %p2928_p0 = scmp.ge.s32.totalorder %s3606_s24, 1  ;;  %s3606_s24 = sphi %s3698_s24, %s27_s24  }
   0x4   : > { %p488_p1 = scmp.lt.s32.totalorder %s3606_s24, 3 }
   0x6   : > { %p489_p2 = pnand %p2928_p0, %p488_p1 }
   0x7   : > { %s4334_s28 = sld [smem:[#allocation3_spill]] (!%p489_p2)  ;;  %s2929_s29 = sshll.u32 (!%p489_p2), %s2924_s25, 5 }
   0x8   : > { %492 = sbr.rel (%p489_p2) target bundleno = 1730 (0x6c2), region = 88  ;;  %p541_p3 = scmp.lt.s32.totalorder (!%p489_p2), %s2929_s29, 63 }
   0x9   : > { %s4335_s27 = sld [smem:[#allocation2_spill]] (!%p489_p2) }
   0xd   : > { %v3567_v0 = vld [vmem:[%s4334_s28 + $0x18] sm:$0xff]   ;;  %v3568_v1 = vld [vmem:[%s4334_s28 + $0x10] sm:$0xff]   ;;  %v3569_v2 = vld [vmem:[%s4334_s28 + $0x8] sm:$0xff]   ;;  %s4337_s29 = smov (!%p541_p3, %s2929_s29), 63  ;;  %vm640_vm0 = vcmask 523264   ;;  %vm1497_vm1 = vcmask 261120  }
   0xe   : > { %3233 = vmatprep.subr.bf16.mxu0 %v3567_v0  ;;  %v3571_v3 = vld [vmem:[%s4316_s3 + $0x38] sm:$0xff]   ;;  %s2930_s21 = sshll.u32 %s4337_s29, 3  ;;  %v3572_v4 = vld [vmem:[%s4316_s3 + $0x30] sm:$0xff]   ;;  %v3570_v7 = vld [vmem:[%s4334_s28] sm:$0xff]   ;;  %vm1770_vm2 = vcmask 130048  }
   0xf   : > { %3234 = vmatpush3.bf16.msra.mxu0 %v3567_v0  ;;  %s3729_s0 = scalar_lea.vmem %s4335_s27, %s2930_s21  ;;  %3273 = vmatprep.subr.bf16.mxu1 %v3571_v3  ;;  %v3573_v9 = vld [vmem:[%s4316_s3 + $0x28] sm:$0xff]   ;;  %v3574_v20 = vld [vmem:[%s4316_s3 + $0x20] sm:$0xff]   ;;  %v3575_v21 = vld [vmem:[%s4316_s3 + $0x18] sm:$0xff]   ;;  %s4212_s26 = scalar_lea.vmem %s4330_s17, %s2930_s21 }
  0x10   : > { %3235 = vmatprep.subr.bf16.mxu0 %v3568_v1  ;;  %v553_v5 = vld [vmem:[%s3729_s0] sm:$0xff]  ;;  %v554_v6 = vld [vmem:[%s3729_s0 + $0x8] sm:$0xff]  ;;  %3274 = vmatpush3.bf16.msra.mxu1 %v3571_v3  ;;  %v555_v10 = vld [vmem:[%s3729_s0 + $0x10] sm:$0xff] }
  0x11   : > { %v585_v8 = vpack.c.bf16 %v554_v6, %v553_v5  ;;  %3275 = vmatprep.subr.bf16.mxu1 %v3572_v4  ;;  %v556_v11 = vld [vmem:[%s3729_s0 + $0x18] sm:$0xff]  ;;  %v557_v12 = vld [vmem:[%s3729_s0 + $0x20] sm:$0xff]  ;;  %v558_v13 = vld [vmem:[%s3729_s0 + $0x28] sm:$0xff] }
  0x12   : > { %v586_v14 = vpack.c.bf16 %v556_v11, %v555_v10  ;;  %v587_v15 = vpack.c.bf16 %v558_v13, %v557_v12  ;;  %v559_v16 = vld [vmem:[%s3729_s0 + $0x30] sm:$0xff]  ;;  %v560_v17 = vld [vmem:[%s3729_s0 + $0x38] sm:$0xff]  ;;  %v561_v18 = vld [vmem:[%s3729_s0 + $0x40] sm:$0xff] }
  0x13   : > { %3236 = vmatpush3.bf16.msra.mxu0 %v3568_v1  ;;  %3241 = vmatprep.mubr.msk.bf16.mxu0 %vm640_vm0, %v585_v8  ;;  %v562_v19 = vld [vmem:[%s3729_s0 + $0x48] sm:$0xff]  ;;  %v588_v22 = vpack.c.bf16 %v560_v17, %v559_v16  ;;  %v563_v24 = vld [vmem:[%s3729_s0 + $0x50] sm:$0xff]  ;;  %v564_v25 = vld [vmem:[%s3729_s0 + $0x58] sm:$0xff] }
  0x14   : > { %3237 = vmatprep.subr.bf16.mxu0 %v3569_v2  ;;  %3276 = vmatpush3.bf16.msra.mxu1 %v3572_v4  ;;  %v589_v23 = vpack.c.bf16 %v562_v19, %v561_v18  ;;  %v565_v26 = vld [vmem:[%s3729_s0 + $0x60] sm:$0xff]  ;;  %v566_v27 = vld [vmem:[%s3729_s0 + $0x68] sm:$0xff]  ;;  %v590_v28 = vpack.c.bf16 %v564_v25, %v563_v24  ;;  %v567_v30 = vld [vmem:[%s3729_s0 + $0x70] sm:$0xff] }
  0x15   : > { %3277 = vmatprep.subr.bf16.mxu1 %v3573_v9  ;;  %v591_v29 = vpack.c.bf16 %v566_v27, %v565_v26  ;;  %v568_v31 = vld [vmem:[%s3729_s0 + $0x78] sm:$0xff]  ;;  %v569_v32 = vld [vmem:[%s3729_s0 + $0x80] sm:$0xff]  ;;  %v570_v33 = vld [vmem:[%s3729_s0 + $0x88] sm:$0xff] }
  0x16   : > { %v592_v34 = vpack.c.bf16 %v568_v31, %v567_v30  ;;  %v593_v35 = vpack.c.bf16 %v570_v33, %v569_v32  ;;  %v571_v36 = vld [vmem:[%s3729_s0 + $0x90] sm:$0xff]  ;;  %v572_v37 = vld [vmem:[%s3729_s0 + $0x98] sm:$0xff]  ;;  %v573_v38 = vld [vmem:[%s3729_s0 + $0xa0] sm:$0xff] }
  0x17   : > { %3238 = vmatpush3.bf16.msra.mxu0 %v3569_v2  ;;  %v574_v39 = vld [vmem:[%s3729_s0 + $0xa8] sm:$0xff]  ;;  %v594_v40 = vpack.c.bf16 %v572_v37, %v571_v36  ;;  %v575_v42 = vld [vmem:[%s3729_s0 + $0xb0] sm:$0xff]  ;;  %v576_v43 = vld [vmem:[%s3729_s0 + $0xb8] sm:$0xff] }
  0x18   : > { %3239 = vmatprep.subr.bf16.mxu0 %v3570_v7  ;;  %3278 = vmatpush3.bf16.msra.mxu1 %v3573_v9  ;;  %v595_v41 = vpack.c.bf16 %v574_v39, %v573_v38  ;;  %v577_v44 = vld [vmem:[%s3729_s0 + $0xc0] sm:$0xff]  ;;  %v578_v45 = vld [vmem:[%s3729_s0 + $0xc8] sm:$0xff]  ;;  %v596_v46 = vpack.c.bf16 %v576_v43, %v575_v42  ;;  %v579_v48 = vld [vmem:[%s3729_s0 + $0xd0] sm:$0xff] }
  0x19   : > { %3279 = vmatprep.subr.bf16.mxu1 %v3574_v20  ;;  %v597_v47 = vpack.c.bf16 %v578_v45, %v577_v44  ;;  %v580_v49 = vld [vmem:[%s3729_s0 + $0xd8] sm:$0xff]  ;;  %v581_v50 = vld [vmem:[%s3729_s0 + $0xe0] sm:$0xff]  ;;  %v582_v51 = vld [vmem:[%s3729_s0 + $0xe8] sm:$0xff] }
  0x1a   : > { %v598_v52 = vpack.c.bf16 %v580_v49, %v579_v48  ;;  %v599_v53 = vpack.c.bf16 %v582_v51, %v581_v50  ;;  %v583_v54 = vld [vmem:[%s3729_s0 + $0xf0] sm:$0xff]  ;;  %v584_v55 = vld [vmem:[%s3729_s0 + $0xf8] sm:$0xff]  ;;  %v3577_v58 = vld [vmem:[%s4316_s3 + $0x8] sm:$0xff]  }
  0x1b   : > { %3240 = vmatpush3.bf16.msra.mxu0 %v3570_v7  ;;  %v600_v56 = vpack.c.bf16 %v584_v55, %v583_v54  ;;  %v3576_v57 = vld [vmem:[%s4316_s3 + $0x10] sm:$0xff]   ;;  %v3578_v59 = vld [vmem:[%s4316_s3] sm:$0xff]   ;;  %v3579_v60 = vld [vmem:[%s4318_s5 + $0x18] sm:$0xff]  }
  0x1c   : > { %3280 = vmatpush3.bf16.msra.mxu1 %v3574_v20  ;;  %v3580_v61 = vld [vmem:[%s4318_s5 + $0x10] sm:$0xff]   ;;  %3321 = vmatprep.subr.bf16.mxu0 %v3579_v60  ;;  %v3581_v62 = vld [vmem:[%s4318_s5 + $0x8] sm:$0xff]   ;;  %v3582_v63 = vld [vmem:[%s4318_s5] sm:$0xff]  }
  0x1d   : > { %3281 = vmatprep.subr.bf16.mxu1 %v3575_v21  ;;  %v3815_v2 = vld [vmem:[%s4315_s2] ss:$0 sm:$0xff] }
  0x1e   : > { %3242 = vmatmul.mubr.msk.bf16.vlgmr.msra.gmra.mxu0 %vm640_vm0, %v586_v14 }
  0x1f   : > { %3245 = vmatprep.mubr.msk.bf16.mxu0 %vm640_vm0, %v587_v15  ;;  %3322 = vmatpush3.bf16.msra.mxu0 %v3579_v60 }
  0x20   : > { %3282 = vmatpush3.bf16.msra.mxu1 %v3575_v21  ;;  %3323 = vmatprep.subr.bf16.mxu0 %v3580_v61 }
  0x21   : > { %3283 = vmatprep.subr.bf16.mxu1 %v3576_v57 }
  0x23   : > { %3324 = vmatpush3.bf16.msra.mxu0 %v3580_v61 }
  0x24   : > { %3284 = vmatpush3.bf16.msra.mxu1 %v3576_v57  ;;  %3325 = vmatprep.subr.bf16.mxu0 %v3581_v62 }
  0x25   : > { %3285 = vmatprep.subr.bf16.mxu1 %v3577_v58 }
  0x26   : > { %3246 = vmatmul.mubr.msk.bf16.gmra.mxu0 %vm640_vm0, %v588_v22 }
  0x27   : > { %3249 = vmatprep.mubr.msk.bf16.mxu0 %vm640_vm0, %v589_v23  ;;  %3326 = vmatpush3.bf16.msra.mxu0 %v3581_v62 }
  0x28   : > { %3286 = vmatpush3.bf16.msra.mxu1 %v3577_v58  ;;  %3327 = vmatprep.subr.bf16.mxu0 %v3582_v63 }
  0x29   : > { %3287 = vmatprep.subr.bf16.mxu1 %v3578_v59 }
  0x2b   : > { %3328 = vmatpush3.bf16.msra.mxu0 %v3582_v63 }
  0x2c   : > { %3288 = vmatpush3.bf16.msra.mxu1 %v3578_v59 }
  0x2e   : > { %3250 = vmatmul.mubr.msk.bf16.gmra.mxu0 %vm640_vm0, %v590_v28 }
  0x2f   : > { %3253 = vmatprep.mubr.msk.bf16.mxu0 %vm640_vm0, %v591_v29 }
  0x36   : > { %3254 = vmatmul.mubr.msk.bf16.gmra.mxu0 %vm640_vm0, %v592_v34 }
  0x37   : > { %3257 = vmatprep.mubr.msk.bf16.mxu0 %vm640_vm0, %v593_v35 }
  0x3e   : > { %3258 = vmatmul.mubr.msk.bf16.gmra.mxu0 %vm640_vm0, %v594_v40 }
  0x3f   : > { %3261 = vmatprep.mubr.msk.bf16.mxu0 %vm640_vm0, %v595_v41 }
  0x46   : > { %3262 = vmatmul.mubr.msk.bf16.gmra.mxu0 %vm640_vm0, %v596_v46 }
  0x47   : > { %3265 = vmatprep.mubr.msk.bf16.mxu0 %vm640_vm0, %v597_v47 }
  0x4e   : > { %3266 = vmatmul.mubr.msk.bf16.gmra.mxu0 %vm640_vm0, %v598_v52 }
  0x4f   : > { %3269 = vmatprep.mubr.msk.bf16.mxu0 %vm640_vm0, %v599_v53 }
  0x56   : > { %3270 = vmatmul.mubr.msk.bf16.gmra.mxu0 %vm640_vm0, %v600_v56 }
  0xde   : > { %v3243_v0 = vpop.f32.mrf.mxu0 }
  0xdf   : > { %v732_v6 = vadd.f32 %v3243_v0, %v3815_v2 }
  0xe0   : > { %v723_v1 = vpop.f32.mrf.mxu0 }
  0xe1   : > { %v724_v4 = vadd.f32 %v3815_v2, %v723_v1  ;;  %v852_v13 = vmax.f32 %v732_v6, 0.0 }
  0xe2   : > { %v3244_v3 = vpop.f32.mrf.mxu0 }
  0xe3   : > { %v735_v5 = vadd.f32 %v3244_v3, %v3815_v2  ;;  %v850_v11 = vmax.f32 %v724_v4, 0.0 }
  0xe4   : > { %v726_v7 = vpop.f32.mrf.mxu0 }
  0xe5   : > { %v727_v8 = vadd.f32 %v3815_v2, %v726_v7  ;;  %v853_v9 = vmax.f32 %v735_v5, 0.0 }
  0xe6   : > { %v3247_v10 = vpop.f32.mrf.mxu0 }
  0xe7   : > { %v851_v12 = vmax.f32 %v727_v8, 0.0  ;;  %v883_v16 = vpack.c.bf16 %v853_v9, %v852_v13  ;;  %v748_v20 = vadd.f32 %v3247_v10, %v3815_v2 }
  0xe8   : > { %v739_v14 = vpop.f32.mrf.mxu0 }
  0xe9   : > { %v882_v15 = vpack.c.bf16 %v851_v12, %v850_v11  ;;  %v740_v18 = vadd.f32 %v3815_v2, %v739_v14  ;;  %v856_v27 = vmax.f32 %v748_v20, 0.0 }
  0xea   : > { %v3248_v17 = vpop.f32.mrf.mxu0 }
  0xeb   : > { %v751_v19 = vadd.f32 %v3248_v17, %v3815_v2  ;;  %3289 = vmatprep.mubr.bf16.mxu1 %v882_v15  ;;  %v854_v25 = vmax.f32 %v740_v18, 0.0 }
  0xec   : > { %v742_v21 = vpop.f32.mrf.mxu0  ;;  %3290 = vmatmul.mubr.bf16.vlgmr.msra.gmra.mxu1 %v883_v16 }
  0xed   : > { %v743_v22 = vadd.f32 %v3815_v2, %v742_v21  ;;  %v857_v23 = vmax.f32 %v751_v19, 0.0 }
  0xee   : > { %v3251_v24 = vpop.f32.mrf.mxu0 }
  0xef   : > { %v855_v26 = vmax.f32 %v743_v22, 0.0  ;;  %v885_v30 = vpack.c.bf16 %v857_v23, %v856_v27  ;;  %v764_v34 = vadd.f32 %v3251_v24, %v3815_v2 }
  0xf0   : > { %v755_v28 = vpop.f32.mrf.mxu0 }
  0xf1   : > { %v884_v29 = vpack.c.bf16 %v855_v26, %v854_v25  ;;  %v756_v32 = vadd.f32 %v3815_v2, %v755_v28  ;;  %v860_v41 = vmax.f32 %v764_v34, 0.0 }
  0xf2   : > { %v3252_v31 = vpop.f32.mrf.mxu0 }
  0xf3   : > { %v767_v33 = vadd.f32 %v3252_v31, %v3815_v2  ;;  %3293 = vmatprep.mubr.bf16.mxu1 %v884_v29  ;;  %v858_v39 = vmax.f32 %v756_v32, 0.0 }
  0xf4   : > { %v758_v35 = vpop.f32.mrf.mxu0  ;;  %3294 = vmatmul.mubr.bf16.gmra.mxu1 %v885_v30 }
  0xf5   : > { %v759_v36 = vadd.f32 %v3815_v2, %v758_v35  ;;  %v861_v37 = vmax.f32 %v767_v33, 0.0 }
  0xf6   : > { %v3255_v38 = vpop.f32.mrf.mxu0 }
  0xf7   : > { %v859_v40 = vmax.f32 %v759_v36, 0.0  ;;  %v887_v44 = vpack.c.bf16 %v861_v37, %v860_v41  ;;  %v780_v48 = vadd.f32 %v3255_v38, %v3815_v2 }
  0xf8   : > { %v771_v42 = vpop.f32.mrf.mxu0 }
  0xf9   : > { %v886_v43 = vpack.c.bf16 %v859_v40, %v858_v39  ;;  %v772_v46 = vadd.f32 %v3815_v2, %v771_v42  ;;  %v864_v55 = vmax.f32 %v780_v48, 0.0 }
  0xfa   : > { %v3256_v45 = vpop.f32.mrf.mxu0 }
  0xfb   : > { %v783_v47 = vadd.f32 %v3256_v45, %v3815_v2  ;;  %3297 = vmatprep.mubr.bf16.mxu1 %v886_v43  ;;  %v862_v53 = vmax.f32 %v772_v46, 0.0 }
  0xfc   : > { %v774_v49 = vpop.f32.mrf.mxu0  ;;  %3298 = vmatmul.mubr.bf16.gmra.mxu1 %v887_v44 }
  0xfd   : > { %v775_v50 = vadd.f32 %v3815_v2, %v774_v49  ;;  %v865_v51 = vmax.f32 %v783_v47, 0.0 }
  0xfe   : > { %v3259_v52 = vpop.f32.mrf.mxu0 }
  0xff   : > { %v863_v54 = vmax.f32 %v775_v50, 0.0  ;;  %v889_v58 = vpack.c.bf16 %v865_v51, %v864_v55  ;;  %v796_v62 = vadd.f32 %v3259_v52, %v3815_v2  ;;  %v3583_v50 = vld [vmem:[%s4320_s7 + $0x8] sm:$0xff]   ;;  %v3584_v51 = vld [vmem:[%s4320_s7] sm:$0xff]  }
 0x100   : > { %v787_v56 = vpop.f32.mrf.mxu0  ;;  %3361 = vmatprep.subr.bf16.mxu0 %v3583_v50  ;;  %3555 = vmatprep.subr.bf16.mxu1 %v3583_v50 }
 0x101   : > { %v888_v57 = vpack.c.bf16 %v863_v54, %v862_v53  ;;  %v788_v60 = vadd.f32 %v3815_v2, %v787_v56  ;;  %v868_v6 = vmax.f32 %v796_v62, 0.0  ;;  %3557 = vmatpush3.bf16.msra.mxu1 %v3583_v50  ;;  %v3858_v53 = vld [vmem:[%s4317_s4] ss:$0 sm:$0xff] }
 0x102   : > { %v3260_v59 = vpop.f32.mrf.mxu0  ;;  %3556 = vmatprep.subr.bf16.mxu1 %v3584_v51 }
 0x103   : > { %v799_v61 = vadd.f32 %v3260_v59, %v3815_v2  ;;  %3301 = vmatprep.mubr.bf16.mxu1 %v888_v57  ;;  %v866_v4 = vmax.f32 %v788_v60, 0.0 }
 0x104   : > { %v790_v63 = vpop.f32.mrf.mxu0  ;;  %3302 = vmatmul.mubr.bf16.gmra.mxu1 %v889_v58 }
 0x105   : > { %v791_v0 = vadd.f32 %v3815_v2, %v790_v63  ;;  %v869_v1 = vmax.f32 %v799_v61, 0.0  ;;  %3558 = vmatpush3.bf16.msra.mxu1 %v3584_v51 }
 0x106   : > { %v3263_v3 = vpop.f32.mrf.mxu0 }
 0x107   : > { %v867_v5 = vmax.f32 %v791_v0, 0.0  ;;  %v891_v9 = vpack.c.bf16 %v869_v1, %v868_v6  ;;  %v812_v13 = vadd.f32 %v3263_v3, %v3815_v2 }
 0x108   : > { %v803_v7 = vpop.f32.mrf.mxu0 }
 0x109   : > { %v890_v8 = vpack.c.bf16 %v867_v5, %v866_v4  ;;  %v804_v11 = vadd.f32 %v3815_v2, %v803_v7  ;;  %v872_v20 = vmax.f32 %v812_v13, 0.0 }
 0x10a   : > { %v3264_v10 = vpop.f32.mrf.mxu0 }
 0x10b   : > { %v815_v12 = vadd.f32 %v3264_v10, %v3815_v2  ;;  %3305 = vmatprep.mubr.bf16.mxu1 %v890_v8  ;;  %v870_v18 = vmax.f32 %v804_v11, 0.0 }
 0x10c   : > { %v806_v14 = vpop.f32.mrf.mxu0  ;;  %3306 = vmatmul.mubr.bf16.gmra.mxu1 %v891_v9 }
 0x10d   : > { %v807_v15 = vadd.f32 %v3815_v2, %v806_v14  ;;  %v873_v16 = vmax.f32 %v815_v12, 0.0 }
 0x10e   : > { %v3267_v17 = vpop.f32.mrf.mxu0 }
 0x10f   : > { %v871_v19 = vmax.f32 %v807_v15, 0.0  ;;  %v893_v23 = vpack.c.bf16 %v873_v16, %v872_v20  ;;  %v828_v27 = vadd.f32 %v3267_v17, %v3815_v2 }
 0x110   : > { %v819_v21 = vpop.f32.mrf.mxu0 }
 0x111   : > { %v892_v22 = vpack.c.bf16 %v871_v19, %v870_v18  ;;  %v820_v25 = vadd.f32 %v3815_v2, %v819_v21  ;;  %v876_v34 = vmax.f32 %v828_v27, 0.0 }
 0x112   : > { %v3268_v24 = vpop.f32.mrf.mxu0 }
 0x113   : > { %v831_v26 = vadd.f32 %v3268_v24, %v3815_v2  ;;  %3309 = vmatprep.mubr.bf16.mxu1 %v892_v22  ;;  %v874_v32 = vmax.f32 %v820_v25, 0.0 }
 0x114   : > { %v822_v28 = vpop.f32.mrf.mxu0  ;;  %3310 = vmatmul.mubr.bf16.gmra.mxu1 %v893_v23 }
 0x115   : > { %v823_v29 = vadd.f32 %v3815_v2, %v822_v28  ;;  %v877_v30 = vmax.f32 %v831_v26, 0.0 }
 0x116   : > { %v3271_v31 = vpop.f32.mrf.mxu0 }
 0x117   : > { %v875_v33 = vmax.f32 %v823_v29, 0.0  ;;  %v895_v37 = vpack.c.bf16 %v877_v30, %v876_v34  ;;  %v844_v41 = vadd.f32 %v3271_v31, %v3815_v2 }
 0x118   : > { %v835_v35 = vpop.f32.mrf.mxu0 }
 0x119   : > { %v894_v36 = vpack.c.bf16 %v875_v33, %v874_v32  ;;  %v836_v39 = vadd.f32 %v3815_v2, %v835_v35  ;;  %v880_v47 = vmax.f32 %v844_v41, 0.0 }
 0x11a   : > { %v3272_v38 = vpop.f32.mrf.mxu0 }
 0x11b   : > { %v847_v40 = vadd.f32 %v3272_v38, %v3815_v2  ;;  %3313 = vmatprep.mubr.bf16.mxu1 %v894_v36  ;;  %v878_v45 = vmax.f32 %v836_v39, 0.0 }
 0x11c   : > { %v838_v42 = vpop.f32.mrf.mxu0  ;;  %3314 = vmatmul.mubr.bf16.gmra.mxu1 %v895_v37 }
 0x11d   : > { %v839_v43 = vadd.f32 %v3815_v2, %v838_v42  ;;  %v881_v44 = vmax.f32 %v847_v40, 0.0 }
 0x11f   : > { %v879_v46 = vmax.f32 %v839_v43, 0.0  ;;  %v897_v49 = vpack.c.bf16 %v881_v44, %v880_v47 }
 0x121   : > { %v896_v48 = vpack.c.bf16 %v879_v46, %v878_v45 }
 0x123   : > { %3317 = vmatprep.mubr.bf16.mxu1 %v896_v48 }
 0x124   : > { %3318 = vmatmul.mubr.bf16.gmra.mxu1 %v897_v49 }
 0x1ac   : > { %v3291_v2 = vpop.f32.mrf.mxu1 }
 0x1ad   : > { %v1012_v57 = vadd.f32 %v3291_v2, %v3858_v53 }
 0x1ae   : > { %v1003_v52 = vpop.f32.mrf.mxu1 }
 0x1af   : > { %v1004_v55 = vadd.f32 %v3858_v53, %v1003_v52  ;;  %v1132_v0 = vmax.f32 %v1012_v57, 0.0 }
 0x1b0   : > { %v3292_v54 = vpop.f32.mrf.mxu1 }
 0x1b1   : > { %v1015_v56 = vadd.f32 %v3292_v54, %v3858_v53  ;;  %v1130_v62 = vmax.f32 %v1004_v55, 0.0 }
 0x1b2   : > { %v1006_v58 = vpop.f32.mrf.mxu1 }
 0x1b3   : > { %v1007_v59 = vadd.f32 %v3858_v53, %v1006_v58  ;;  %v1133_v60 = vmax.f32 %v1015_v56, 0.0 }
 0x1b4   : > { %v3295_v61 = vpop.f32.mrf.mxu1 }
 0x1b5   : > { %v1131_v63 = vmax.f32 %v1007_v59, 0.0  ;;  %v1163_v4 = vpack.c.bf16 %v1133_v60, %v1132_v0  ;;  %v1028_v8 = vadd.f32 %v3295_v61, %v3858_v53 }
 0x1b6   : > { %v1019_v1 = vpop.f32.mrf.mxu1 }
 0x1b7   : > { %v1162_v3 = vpack.c.bf16 %v1131_v63, %v1130_v62  ;;  %v1020_v6 = vadd.f32 %v3858_v53, %v1019_v1  ;;  %v1136_v15 = vmax.f32 %v1028_v8, 0.0 }
 0x1b8   : > { %v3296_v5 = vpop.f32.mrf.mxu1 }
 0x1b9   : > { %v1031_v7 = vadd.f32 %v3296_v5, %v3858_v53  ;;  %3329 = vmatprep.mubr.msk.bf16.mxu0 %vm640_vm0, %v1162_v3  ;;  %v1134_v13 = vmax.f32 %v1020_v6, 0.0 }
 0x1ba   : > { %v1022_v9 = vpop.f32.mrf.mxu1  ;;  %3330 = vmatmul.mubr.msk.bf16.vlgmr.msra.gmra.mxu0 %vm640_vm0, %v1163_v4 }
 0x1bb   : > { %v1023_v10 = vadd.f32 %v3858_v53, %v1022_v9  ;;  %3362 = vmatpush3.bf16.msra.mxu0 %v3583_v50  ;;  %v1137_v11 = vmax.f32 %v1031_v7, 0.0 }
 0x1bc   : > { %v3299_v12 = vpop.f32.mrf.mxu1  ;;  %3363 = vmatprep.subr.bf16.mxu0 %v3584_v51 }
 0x1bd   : > { %v1135_v14 = vmax.f32 %v1023_v10, 0.0  ;;  %v1165_v18 = vpack.c.bf16 %v1137_v11, %v1136_v15  ;;  %v1044_v22 = vadd.f32 %v3299_v12, %v3858_v53 }
 0x1be   : > { %v1035_v16 = vpop.f32.mrf.mxu1 }
 0x1bf   : > { %v1164_v17 = vpack.c.bf16 %v1135_v14, %v1134_v13  ;;  %3364 = vmatpush3.bf16.msra.mxu0 %v3584_v51  ;;  %v1036_v20 = vadd.f32 %v3858_v53, %v1035_v16  ;;  %v1140_v29 = vmax.f32 %v1044_v22, 0.0 }
 0x1c0   : > { %v3300_v19 = vpop.f32.mrf.mxu1 }
 0x1c1   : > { %v1047_v21 = vadd.f32 %v3300_v19, %v3858_v53  ;;  %3333 = vmatprep.mubr.msk.bf16.mxu0 %vm640_vm0, %v1164_v17  ;;  %v1138_v27 = vmax.f32 %v1036_v20, 0.0 }
 0x1c2   : > { %v1038_v23 = vpop.f32.mrf.mxu1  ;;  %3334 = vmatmul.mubr.msk.bf16.gmra.mxu0 %vm640_vm0, %v1165_v18 }
 0x1c3   : > { %v1039_v24 = vadd.f32 %v3858_v53, %v1038_v23  ;;  %v1141_v25 = vmax.f32 %v1047_v21, 0.0 }
 0x1c4   : > { %v3303_v26 = vpop.f32.mrf.mxu1 }
 0x1c5   : > { %v1139_v28 = vmax.f32 %v1039_v24, 0.0  ;;  %v1167_v32 = vpack.c.bf16 %v1141_v25, %v1140_v29  ;;  %v1060_v36 = vadd.f32 %v3303_v26, %v3858_v53 }
 0x1c6   : > { %v1051_v30 = vpop.f32.mrf.mxu1 }
 0x1c7   : > { %v1166_v31 = vpack.c.bf16 %v1139_v28, %v1138_v27  ;;  %v1052_v34 = vadd.f32 %v3858_v53, %v1051_v30  ;;  %v1144_v43 = vmax.f32 %v1060_v36, 0.0 }
 0x1c8   : > { %v3304_v33 = vpop.f32.mrf.mxu1 }
 0x1c9   : > { %v1063_v35 = vadd.f32 %v3304_v33, %v3858_v53  ;;  %3337 = vmatprep.mubr.msk.bf16.mxu0 %vm640_vm0, %v1166_v31  ;;  %v1142_v41 = vmax.f32 %v1052_v34, 0.0 }
 0x1ca   : > { %v1054_v37 = vpop.f32.mrf.mxu1  ;;  %3338 = vmatmul.mubr.msk.bf16.gmra.mxu0 %vm640_vm0, %v1167_v32 }
 0x1cb   : > { %v1055_v38 = vadd.f32 %v3858_v53, %v1054_v37  ;;  %v1145_v39 = vmax.f32 %v1063_v35, 0.0 }
 0x1cc   : > { %v3307_v40 = vpop.f32.mrf.mxu1 }
 0x1cd   : > { %v1143_v42 = vmax.f32 %v1055_v38, 0.0  ;;  %v1169_v46 = vpack.c.bf16 %v1145_v39, %v1144_v43  ;;  %v1076_v50 = vadd.f32 %v3307_v40, %v3858_v53  ;;  %v3911_v40 = vld [vmem:[%s4319_s6] ss:$0 sm:$0xff] }
 0x1ce   : > { %v1067_v44 = vpop.f32.mrf.mxu1 }
 0x1cf   : > { %v1168_v45 = vpack.c.bf16 %v1143_v42, %v1142_v41  ;;  %v1068_v48 = vadd.f32 %v3858_v53, %v1067_v44  ;;  %v1148_v57 = vmax.f32 %v1076_v50, 0.0 }
 0x1d0   : > { %v3308_v47 = vpop.f32.mrf.mxu1 }
 0x1d1   : > { %v1079_v49 = vadd.f32 %v3308_v47, %v3858_v53  ;;  %3341 = vmatprep.mubr.msk.bf16.mxu0 %vm640_vm0, %v1168_v45  ;;  %v1146_v55 = vmax.f32 %v1068_v48, 0.0 }
 0x1d2   : > { %v1070_v51 = vpop.f32.mrf.mxu1  ;;  %3342 = vmatmul.mubr.msk.bf16.gmra.mxu0 %vm640_vm0, %v1169_v46 }
 0x1d3   : > { %v1071_v2 = vadd.f32 %v3858_v53, %v1070_v51  ;;  %v1149_v52 = vmax.f32 %v1079_v49, 0.0 }
 0x1d4   : > { %v3311_v54 = vpop.f32.mrf.mxu1 }
 0x1d5   : > { %v1147_v56 = vmax.f32 %v1071_v2, 0.0  ;;  %v1171_v60 = vpack.c.bf16 %v1149_v52, %v1148_v57  ;;  %v1092_v0 = vadd.f32 %v3311_v54, %v3858_v53 }
 0x1d6   : > { %v1083_v58 = vpop.f32.mrf.mxu1 }
 0x1d7   : > { %v1170_v59 = vpack.c.bf16 %v1147_v56, %v1146_v55  ;;  %v1084_v62 = vadd.f32 %v3858_v53, %v1083_v58  ;;  %v1152_v8 = vmax.f32 %v1092_v0, 0.0 }
 0x1d8   : > { %v3312_v61 = vpop.f32.mrf.mxu1 }
 0x1d9   : > { %v1095_v63 = vadd.f32 %v3312_v61, %v3858_v53  ;;  %3345 = vmatprep.mubr.msk.bf16.mxu0 %vm640_vm0, %v1170_v59  ;;  %v1150_v6 = vmax.f32 %v1084_v62, 0.0 }
 0x1da   : > { %v1086_v1 = vpop.f32.mrf.mxu1  ;;  %3346 = vmatmul.mubr.msk.bf16.gmra.mxu0 %vm640_vm0, %v1171_v60 }
 0x1db   : > { %v1087_v3 = vadd.f32 %v3858_v53, %v1086_v1  ;;  %v1153_v4 = vmax.f32 %v1095_v63, 0.0 }
 0x1dc   : > { %v3315_v5 = vpop.f32.mrf.mxu1 }
 0x1dd   : > { %v1151_v7 = vmax.f32 %v1087_v3, 0.0  ;;  %v1173_v11 = vpack.c.bf16 %v1153_v4, %v1152_v8  ;;  %v1108_v15 = vadd.f32 %v3315_v5, %v3858_v53 }
 0x1de   : > { %v1099_v9 = vpop.f32.mrf.mxu1 }
 0x1df   : > { %v1172_v10 = vpack.c.bf16 %v1151_v7, %v1150_v6  ;;  %v1100_v13 = vadd.f32 %v3858_v53, %v1099_v9  ;;  %v1156_v22 = vmax.f32 %v1108_v15, 0.0 }
 0x1e0   : > { %v3316_v12 = vpop.f32.mrf.mxu1 }
 0x1e1   : > { %v1111_v14 = vadd.f32 %v3316_v12, %v3858_v53  ;;  %3349 = vmatprep.mubr.msk.bf16.mxu0 %vm640_vm0, %v1172_v10  ;;  %v1154_v20 = vmax.f32 %v1100_v13, 0.0 }
 0x1e2   : > { %v1102_v16 = vpop.f32.mrf.mxu1  ;;  %3350 = vmatmul.mubr.msk.bf16.gmra.mxu0 %vm640_vm0, %v1173_v11 }
 0x1e3   : > { %v1103_v17 = vadd.f32 %v3858_v53, %v1102_v16  ;;  %v1157_v18 = vmax.f32 %v1111_v14, 0.0 }
 0x1e4   : > { %v3319_v19 = vpop.f32.mrf.mxu1 }
 0x1e5   : > { %v1155_v21 = vmax.f32 %v1103_v17, 0.0  ;;  %v1175_v25 = vpack.c.bf16 %v1157_v18, %v1156_v22  ;;  %v1124_v29 = vadd.f32 %v3319_v19, %v3858_v53 }
 0x1e6   : > { %v1115_v23 = vpop.f32.mrf.mxu1 }
 0x1e7   : > { %v1174_v24 = vpack.c.bf16 %v1155_v21, %v1154_v20  ;;  %v1116_v27 = vadd.f32 %v3858_v53, %v1115_v23  ;;  %v1160_v35 = vmax.f32 %v1124_v29, 0.0 }
 0x1e8   : > { %v3320_v26 = vpop.f32.mrf.mxu1 }
 0x1e9   : > { %v1127_v28 = vadd.f32 %v3320_v26, %v3858_v53  ;;  %3353 = vmatprep.mubr.msk.bf16.mxu0 %vm640_vm0, %v1174_v24  ;;  %v1158_v33 = vmax.f32 %v1116_v27, 0.0 }
 0x1ea   : > { %v1118_v30 = vpop.f32.mrf.mxu1  ;;  %3354 = vmatmul.mubr.msk.bf16.gmra.mxu0 %vm640_vm0, %v1175_v25 }
 0x1eb   : > { %v1119_v31 = vadd.f32 %v3858_v53, %v1118_v30  ;;  %v1161_v32 = vmax.f32 %v1127_v28, 0.0 }
 0x1ed   : > { %v1159_v34 = vmax.f32 %v1119_v31, 0.0  ;;  %v1177_v37 = vpack.c.bf16 %v1161_v32, %v1160_v35 }
 0x1ef   : > { %v1176_v36 = vpack.c.bf16 %v1159_v34, %v1158_v33 }
 0x1f1   : > { %3357 = vmatprep.mubr.msk.bf16.mxu0 %vm640_vm0, %v1176_v36 }
 0x1f2   : > { %3358 = vmatmul.mubr.msk.bf16.gmra.mxu0 %vm640_vm0, %v1177_v37 }
 0x27a   : > { %v3331_v38 = vpop.f32.mrf.mxu0 }
 0x27b   : > { %v1308_v43 = vadd.f32 %v3331_v38, %v3911_v40 }
 0x27c   : > { %v1299_v39 = vpop.f32.mrf.mxu0 }
 0x27d   : > { %v1300_v53 = vadd.f32 %v3911_v40, %v1299_v39  ;;  %v1428_v50 = vmax.f32 %v1308_v43, 0.0 }
 0x27e   : > { %v3332_v41 = vpop.f32.mrf.mxu0 }
 0x27f   : > { %v1311_v42 = vadd.f32 %v3332_v41, %v3911_v40  ;;  %v1426_v48 = vmax.f32 %v1300_v53, 0.0 }
 0x280   : > { %v1302_v44 = vpop.f32.mrf.mxu0 }
 0x281   : > { %v1303_v45 = vadd.f32 %v3911_v40, %v1302_v44  ;;  %v1429_v46 = vmax.f32 %v1311_v42, 0.0 }
 0x282   : > { %v3335_v47 = vpop.f32.mrf.mxu0 }
 0x283   : > { %v1427_v49 = vmax.f32 %v1303_v45, 0.0  ;;  %v1459_v52 = vpack.c.bf16 %v1429_v46, %v1428_v50  ;;  %v1324_v57 = vadd.f32 %v3335_v47, %v3911_v40 }
 0x284   : > { %v1315_v51 = vpop.f32.mrf.mxu0 }
 0x285   : > { %v1458_v2 = vpack.c.bf16 %v1427_v49, %v1426_v48  ;;  %v1316_v55 = vadd.f32 %v3911_v40, %v1315_v51  ;;  %v1432_v0 = vmax.f32 %v1324_v57, 0.0 }
 0x286   : > { %v3336_v54 = vpop.f32.mrf.mxu0 }
 0x287   : > { %v1327_v56 = vadd.f32 %v3336_v54, %v3911_v40  ;;  %3365 = vmatprep.mubr.msk.bf16.mxu0 %vm1497_vm1, %v1458_v2  ;;  %v1430_v62 = vmax.f32 %v1316_v55, 0.0 }
 0x288   : > { %v1318_v58 = vpop.f32.mrf.mxu0  ;;  %3366 = vmatmul.mubr.msk.bf16.vlgmr.msra.gmra.mxu0 %vm1497_vm1, %v1459_v52 }
 0x289   : > { %v1319_v59 = vadd.f32 %v3911_v40, %v1318_v58  ;;  %v1433_v60 = vmax.f32 %v1327_v56, 0.0 }
 0x28a   : > { %v3339_v61 = vpop.f32.mrf.mxu0 }
 0x28b   : > { %v1431_v63 = vmax.f32 %v1319_v59, 0.0  ;;  %v1461_v4 = vpack.c.bf16 %v1433_v60, %v1432_v0  ;;  %v1340_v8 = vadd.f32 %v3339_v61, %v3911_v40 }
 0x28c   : > { %v1331_v1 = vpop.f32.mrf.mxu0 }
 0x28d   : > { %v1460_v3 = vpack.c.bf16 %v1431_v63, %v1430_v62  ;;  %v1332_v6 = vadd.f32 %v3911_v40, %v1331_v1  ;;  %v1436_v15 = vmax.f32 %v1340_v8, 0.0 }
 0x28e   : > { %v3340_v5 = vpop.f32.mrf.mxu0 }
 0x28f   : > { %v1343_v7 = vadd.f32 %v3340_v5, %v3911_v40  ;;  %3369 = vmatprep.mubr.msk.bf16.mxu1 %vm1497_vm1, %v1460_v3  ;;  %v1434_v13 = vmax.f32 %v1332_v6, 0.0 }
 0x290   : > { %v1334_v9 = vpop.f32.mrf.mxu0  ;;  %3370 = vmatmul.mubr.msk.bf16.vlgmr.msra.gmra.mxu1 %vm1497_vm1, %v1461_v4 }
 0x291   : > { %v1335_v10 = vadd.f32 %v3911_v40, %v1334_v9  ;;  %v1437_v11 = vmax.f32 %v1343_v7, 0.0 }
 0x292   : > { %v3343_v12 = vpop.f32.mrf.mxu0 }
 0x293   : > { %v1435_v14 = vmax.f32 %v1335_v10, 0.0  ;;  %v1463_v18 = vpack.c.bf16 %v1437_v11, %v1436_v15  ;;  %v1356_v22 = vadd.f32 %v3343_v12, %v3911_v40 }
 0x294   : > { %v1347_v16 = vpop.f32.mrf.mxu0 }
 0x295   : > { %v1462_v17 = vpack.c.bf16 %v1435_v14, %v1434_v13  ;;  %v1348_v20 = vadd.f32 %v3911_v40, %v1347_v16  ;;  %v1440_v29 = vmax.f32 %v1356_v22, 0.0 }
 0x296   : > { %v3344_v19 = vpop.f32.mrf.mxu0 }
 0x297   : > { %v1359_v21 = vadd.f32 %v3344_v19, %v3911_v40  ;;  %3373 = vmatprep.mubr.msk.bf16.mxu1 %vm1497_vm1, %v1462_v17  ;;  %v1438_v27 = vmax.f32 %v1348_v20, 0.0 }
 0x298   : > { %v1350_v23 = vpop.f32.mrf.mxu0  ;;  %3374 = vmatmul.mubr.msk.bf16.gmra.mxu1 %vm1497_vm1, %v1463_v18 }
 0x299   : > { %v1351_v24 = vadd.f32 %v3911_v40, %v1350_v23  ;;  %v1441_v25 = vmax.f32 %v1359_v21, 0.0 }
 0x29a   : > { %v3347_v26 = vpop.f32.mrf.mxu0 }
 0x29b   : > { %v1439_v28 = vmax.f32 %v1351_v24, 0.0  ;;  %v1465_v32 = vpack.c.bf16 %v1441_v25, %v1440_v29  ;;  %v1372_v36 = vadd.f32 %v3347_v26, %v3911_v40  ;;  %v3585_v24 = vld [vmem:[%s4322_s9] sm:$0xff]  }
 0x29c   : > { %v1363_v30 = vpop.f32.mrf.mxu0  ;;  %3397 = vmatprep.subr.bf16.mxu0 %v3585_v24  ;;  %v3587_v25 = vld [vmem:[%s4324_s11] sm:$0xff]  }
 0x29d   : > { %v1464_v31 = vpack.c.bf16 %v1439_v28, %v1438_v27  ;;  %v1364_v34 = vadd.f32 %v3911_v40, %v1363_v30  ;;  %v1444_v43 = vmax.f32 %v1372_v36, 0.0  ;;  %3398 = vmatpush3.bf16.msra.mxu0 %v3585_v24  ;;  %v3973_v28 = vld [vmem:[%s4321_s8] ss:$0 sm:$0xff] }
 0x29e   : > { %v3348_v33 = vpop.f32.mrf.mxu0 }
 0x29f   : > { %v1375_v35 = vadd.f32 %v3348_v33, %v3911_v40  ;;  %3377 = vmatprep.mubr.msk.bf16.mxu1 %vm1497_vm1, %v1464_v31  ;;  %v1442_v53 = vmax.f32 %v1364_v34, 0.0 }
 0x2a0   : > { %v1366_v37 = vpop.f32.mrf.mxu0  ;;  %3378 = vmatmul.mubr.msk.bf16.gmra.mxu1 %vm1497_vm1, %v1465_v32 }
 0x2a1   : > { %v1367_v38 = vadd.f32 %v3911_v40, %v1366_v37  ;;  %v1445_v39 = vmax.f32 %v1375_v35, 0.0 }
 0x2a2   : > { %v3351_v41 = vpop.f32.mrf.mxu0 }
 0x2a3   : > { %v1443_v42 = vmax.f32 %v1367_v38, 0.0  ;;  %v1467_v46 = vpack.c.bf16 %v1445_v39, %v1444_v43  ;;  %v1388_v50 = vadd.f32 %v3351_v41, %v3911_v40 }
 0x2a4   : > { %v1379_v44 = vpop.f32.mrf.mxu0 }
 0x2a5   : > { %v1466_v45 = vpack.c.bf16 %v1443_v42, %v1442_v53  ;;  %v1380_v48 = vadd.f32 %v3911_v40, %v1379_v44  ;;  %v1448_v57 = vmax.f32 %v1388_v50, 0.0 }
 0x2a6   : > { %v3352_v47 = vpop.f32.mrf.mxu0 }
 0x2a7   : > { %v1391_v49 = vadd.f32 %v3352_v47, %v3911_v40  ;;  %3381 = vmatprep.mubr.msk.bf16.mxu1 %vm1497_vm1, %v1466_v45  ;;  %v1446_v55 = vmax.f32 %v1380_v48, 0.0 }
 0x2a8   : > { %v1382_v51 = vpop.f32.mrf.mxu0  ;;  %3382 = vmatmul.mubr.msk.bf16.gmra.mxu1 %vm1497_vm1, %v1467_v46 }
 0x2a9   : > { %v1383_v2 = vadd.f32 %v3911_v40, %v1382_v51  ;;  %v1449_v52 = vmax.f32 %v1391_v49, 0.0 }
 0x2aa   : > { %v3355_v54 = vpop.f32.mrf.mxu0 }
 0x2ab   : > { %v1447_v56 = vmax.f32 %v1383_v2, 0.0  ;;  %v1469_v60 = vpack.c.bf16 %v1449_v52, %v1448_v57  ;;  %v1404_v0 = vadd.f32 %v3355_v54, %v3911_v40 }
 0x2ac   : > { %v1395_v58 = vpop.f32.mrf.mxu0 }
 0x2ad   : > { %v1468_v59 = vpack.c.bf16 %v1447_v56, %v1446_v55  ;;  %v1396_v62 = vadd.f32 %v3911_v40, %v1395_v58  ;;  %v1452_v8 = vmax.f32 %v1404_v0, 0.0 }
 0x2ae   : > { %v3356_v61 = vpop.f32.mrf.mxu0 }
 0x2af   : > { %v1407_v63 = vadd.f32 %v3356_v61, %v3911_v40  ;;  %3385 = vmatprep.mubr.msk.bf16.mxu1 %vm1497_vm1, %v1468_v59  ;;  %v1450_v6 = vmax.f32 %v1396_v62, 0.0 }
 0x2b0   : > { %v1398_v1 = vpop.f32.mrf.mxu0  ;;  %3386 = vmatmul.mubr.msk.bf16.gmra.mxu1 %vm1497_vm1, %v1469_v60 }
 0x2b1   : > { %v1399_v3 = vadd.f32 %v3911_v40, %v1398_v1  ;;  %v1453_v4 = vmax.f32 %v1407_v63, 0.0 }
 0x2b2   : > { %v3359_v5 = vpop.f32.mrf.mxu0 }
 0x2b3   : > { %v1451_v7 = vmax.f32 %v1399_v3, 0.0  ;;  %v1471_v11 = vpack.c.bf16 %v1453_v4, %v1452_v8  ;;  %v1420_v15 = vadd.f32 %v3359_v5, %v3911_v40 }
 0x2b4   : > { %v1411_v9 = vpop.f32.mrf.mxu0 }
 0x2b5   : > { %v1470_v10 = vpack.c.bf16 %v1451_v7, %v1450_v6  ;;  %v1412_v13 = vadd.f32 %v3911_v40, %v1411_v9  ;;  %v1456_v21 = vmax.f32 %v1420_v15, 0.0 }
 0x2b6   : > { %v3360_v12 = vpop.f32.mrf.mxu0 }
 0x2b7   : > { %v1423_v14 = vadd.f32 %v3360_v12, %v3911_v40  ;;  %3389 = vmatprep.mubr.msk.bf16.mxu1 %vm1497_vm1, %v1470_v10  ;;  %v1454_v19 = vmax.f32 %v1412_v13, 0.0 }
 0x2b8   : > { %v1414_v16 = vpop.f32.mrf.mxu0  ;;  %3390 = vmatmul.mubr.msk.bf16.gmra.mxu1 %vm1497_vm1, %v1471_v11 }
 0x2b9   : > { %v1415_v17 = vadd.f32 %v3911_v40, %v1414_v16  ;;  %v1457_v18 = vmax.f32 %v1423_v14, 0.0  ;;  %v3586_v40 = vld [vmem:[%s4324_s11 + $0x8] sm:$0xff]  }
 0x2ba   : > { %3431 = vmatprep.subr.bf16.mxu1 %v3586_v40 }
 0x2bb   : > { %v1455_v20 = vmax.f32 %v1415_v17, 0.0  ;;  %v1473_v23 = vpack.c.bf16 %v1457_v18, %v1456_v21  ;;  %3432 = vmatpush3.bf16.msra.mxu1 %v3586_v40 }
 0x2bc   : > { %3433 = vmatprep.subr.bf16.mxu1 %v3587_v25 }
 0x2bd   : > { %v1472_v22 = vpack.c.bf16 %v1455_v20, %v1454_v19 }
 0x2bf   : > { %3393 = vmatprep.mubr.msk.bf16.mxu1 %vm1497_vm1, %v1472_v22  ;;  %3434 = vmatpush3.bf16.msra.mxu1 %v3587_v25 }
 0x2c0   : > { %3394 = vmatmul.mubr.msk.bf16.gmra.mxu1 %vm1497_vm1, %v1473_v23 }
 0x348   : > { %v3367_v26 = vpop.f32.mrf.mxu0 }
 0x349   : > { %v1589_v32 = vadd.f32 %v3367_v26, %v3973_v28 }
 0x34a   : > { %v1580_v27 = vpop.f32.mrf.mxu0 }
 0x34b   : > { %v1581_v30 = vadd.f32 %v3973_v28, %v1580_v27  ;;  %v1709_v39 = vmax.f32 %v1589_v32, 0.0 }
 0x34c   : > { %v3368_v29 = vpop.f32.mrf.mxu0 }
 0x34d   : > { %v1592_v31 = vadd.f32 %v3368_v29, %v3973_v28  ;;  %v1707_v37 = vmax.f32 %v1581_v30, 0.0 }
 0x34e   : > { %v1583_v33 = vpop.f32.mrf.mxu0 }
 0x34f   : > { %v1584_v34 = vadd.f32 %v3973_v28, %v1583_v33  ;;  %v1710_v35 = vmax.f32 %v1592_v31, 0.0 }
 0x350   : > { %v3371_v36 = vpop.f32.mrf.mxu1 }
 0x351   : > { %v1708_v38 = vmax.f32 %v1584_v34, 0.0  ;;  %v1740_v42 = vpack.c.bf16 %v1710_v35, %v1709_v39  ;;  %v1605_v46 = vadd.f32 %v3371_v36, %v3973_v28 }
 0x352   : > { %v1596_v41 = vpop.f32.mrf.mxu1 }
 0x353   : > { %v1739_v53 = vpack.c.bf16 %v1708_v38, %v1707_v37  ;;  %v1597_v44 = vadd.f32 %v3973_v28, %v1596_v41  ;;  %v1713_v52 = vmax.f32 %v1605_v46, 0.0 }
 0x354   : > { %v3372_v43 = vpop.f32.mrf.mxu1 }
 0x355   : > { %v1608_v45 = vadd.f32 %v3372_v43, %v3973_v28  ;;  %3399 = vmatprep.mubr.msk.bf16.mxu0 %vm1770_vm2, %v1739_v53  ;;  %v1711_v51 = vmax.f32 %v1597_v44, 0.0 }
 0x356   : > { %v1599_v47 = vpop.f32.mrf.mxu1  ;;  %3400 = vmatmul.mubr.msk.bf16.vlgmr.msra.gmra.mxu0 %vm1770_vm2, %v1740_v42 }
 0x357   : > { %v1600_v48 = vadd.f32 %v3973_v28, %v1599_v47  ;;  %v1714_v49 = vmax.f32 %v1608_v45, 0.0 }
 0x358   : > { %v3375_v50 = vpop.f32.mrf.mxu1 }
 0x359   : > { %v1712_v2 = vmax.f32 %v1600_v48, 0.0  ;;  %v1742_v56 = vpack.c.bf16 %v1714_v49, %v1713_v52  ;;  %v1621_v60 = vadd.f32 %v3375_v50, %v3973_v28 }
 0x35a   : > { %v1612_v54 = vpop.f32.mrf.mxu1 }
 0x35b   : > { %v1741_v55 = vpack.c.bf16 %v1712_v2, %v1711_v51  ;;  %v1613_v58 = vadd.f32 %v3973_v28, %v1612_v54  ;;  %v1717_v4 = vmax.f32 %v1621_v60, 0.0 }
 0x35c   : > { %v3376_v57 = vpop.f32.mrf.mxu1 }
 0x35d   : > { %v1624_v59 = vadd.f32 %v3376_v57, %v3973_v28  ;;  %3403 = vmatprep.mubr.msk.bf16.mxu0 %vm1770_vm2, %v1741_v55  ;;  %v1715_v1 = vmax.f32 %v1613_v58, 0.0 }
 0x35e   : > { %v1615_v61 = vpop.f32.mrf.mxu1  ;;  %3404 = vmatmul.mubr.msk.bf16.gmra.mxu0 %vm1770_vm2, %v1742_v56 }
 0x35f   : > { %v1616_v62 = vadd.f32 %v3973_v28, %v1615_v61  ;;  %v1718_v63 = vmax.f32 %v1624_v59, 0.0 }
 0x360   : > { %v3379_v0 = vpop.f32.mrf.mxu1 }
 0x361   : > { %v1716_v3 = vmax.f32 %v1616_v62, 0.0  ;;  %v1744_v7 = vpack.c.bf16 %v1718_v63, %v1717_v4  ;;  %v1637_v11 = vadd.f32 %v3379_v0, %v3973_v28 }
 0x362   : > { %v1628_v5 = vpop.f32.mrf.mxu1 }
 0x363   : > { %v1743_v6 = vpack.c.bf16 %v1716_v3, %v1715_v1  ;;  %v1629_v9 = vadd.f32 %v3973_v28, %v1628_v5  ;;  %v1721_v18 = vmax.f32 %v1637_v11, 0.0 }
 0x364   : > { %v3380_v8 = vpop.f32.mrf.mxu1 }
 0x365   : > { %v1640_v10 = vadd.f32 %v3380_v8, %v3973_v28  ;;  %3407 = vmatprep.mubr.msk.bf16.mxu0 %vm1770_vm2, %v1743_v6  ;;  %v1719_v16 = vmax.f32 %v1629_v9, 0.0 }
 0x366   : > { %v1631_v12 = vpop.f32.mrf.mxu1  ;;  %3408 = vmatmul.mubr.msk.bf16.gmra.mxu0 %vm1770_vm2, %v1744_v7 }
 0x367   : > { %v1632_v13 = vadd.f32 %v3973_v28, %v1631_v12  ;;  %v1722_v14 = vmax.f32 %v1640_v10, 0.0 }
 0x368   : > { %v3383_v15 = vpop.f32.mrf.mxu1 }
 0x369   : > { %v1720_v17 = vmax.f32 %v1632_v13, 0.0  ;;  %v1746_v21 = vpack.c.bf16 %v1722_v14, %v1721_v18  ;;  %v1653_v40 = vadd.f32 %v3383_v15, %v3973_v28  ;;  %v3588_v13 = vld [vmem:[%s4326_s13 + $0x18] sm:$0xff]   ;;  %v3589_v14 = vld [vmem:[%s4326_s13 + $0x10] sm:$0xff]   ;;  %v3591_v15 = vld [vmem:[%s4326_s13] sm:$0xff]  }
 0x36a   : > { %v1644_v19 = vpop.f32.mrf.mxu1  ;;  %3467 = vmatprep.subr.bf16.mxu0 %v3588_v13  ;;  %v4038_v18 = vld [vmem:[%s4323_s10] ss:$0 sm:$0xff] }
 0x36b   : > { %v1745_v20 = vpack.c.bf16 %v1720_v17, %v1719_v16  ;;  %v1645_v23 = vadd.f32 %v3973_v28, %v1644_v19  ;;  %v1725_v32 = vmax.f32 %v1653_v40, 0.0  ;;  %3468 = vmatpush3.bf16.msra.mxu0 %v3588_v13 }
 0x36c   : > { %v3384_v22 = vpop.f32.mrf.mxu1  ;;  %3469 = vmatprep.subr.bf16.mxu0 %v3589_v14 }
 0x36d   : > { %v1656_v24 = vadd.f32 %v3384_v22, %v3973_v28  ;;  %3411 = vmatprep.mubr.msk.bf16.mxu0 %vm1770_vm2, %v1745_v20  ;;  %v1723_v30 = vmax.f32 %v1645_v23, 0.0 }
 0x36e   : > { %v1647_v25 = vpop.f32.mrf.mxu1  ;;  %3412 = vmatmul.mubr.msk.bf16.gmra.mxu0 %vm1770_vm2, %v1746_v21 }
 0x36f   : > { %v1648_v26 = vadd.f32 %v3973_v28, %v1647_v25  ;;  %v1726_v27 = vmax.f32 %v1656_v24, 0.0  ;;  %3470 = vmatpush3.bf16.msra.mxu0 %v3589_v14 }
 0x370   : > { %v3387_v29 = vpop.f32.mrf.mxu1 }
 0x371   : > { %v1724_v31 = vmax.f32 %v1648_v26, 0.0  ;;  %v1748_v35 = vpack.c.bf16 %v1726_v27, %v1725_v32  ;;  %v1669_v39 = vadd.f32 %v3387_v29, %v3973_v28 }
 0x372   : > { %v1660_v33 = vpop.f32.mrf.mxu1 }
 0x373   : > { %v1747_v34 = vpack.c.bf16 %v1724_v31, %v1723_v30  ;;  %v1661_v37 = vadd.f32 %v3973_v28, %v1660_v33  ;;  %v1729_v46 = vmax.f32 %v1669_v39, 0.0 }
 0x374   : > { %v3388_v36 = vpop.f32.mrf.mxu1 }
 0x375   : > { %v1672_v38 = vadd.f32 %v3388_v36, %v3973_v28  ;;  %3415 = vmatprep.mubr.msk.bf16.mxu0 %vm1770_vm2, %v1747_v34  ;;  %v1727_v44 = vmax.f32 %v1661_v37, 0.0 }
 0x376   : > { %v1663_v41 = vpop.f32.mrf.mxu1  ;;  %3416 = vmatmul.mubr.msk.bf16.gmra.mxu0 %vm1770_vm2, %v1748_v35 }
 0x377   : > { %v1664_v53 = vadd.f32 %v3973_v28, %v1663_v41  ;;  %v1730_v42 = vmax.f32 %v1672_v38, 0.0 }
 0x378   : > { %v3391_v43 = vpop.f32.mrf.mxu1 }
 0x379   : > { %v1728_v45 = vmax.f32 %v1664_v53, 0.0  ;;  %v1750_v49 = vpack.c.bf16 %v1730_v42, %v1729_v46  ;;  %v1685_v52 = vadd.f32 %v3391_v43, %v3973_v28 }
 0x37a   : > { %v1676_v47 = vpop.f32.mrf.mxu1 }
 0x37b   : > { %v1749_v48 = vpack.c.bf16 %v1728_v45, %v1727_v44  ;;  %v1677_v51 = vadd.f32 %v3973_v28, %v1676_v47  ;;  %v1733_v60 = vmax.f32 %v1685_v52, 0.0 }
 0x37c   : > { %v3392_v50 = vpop.f32.mrf.mxu1 }
 0x37d   : > { %v1688_v2 = vadd.f32 %v3392_v50, %v3973_v28  ;;  %3419 = vmatprep.mubr.msk.bf16.mxu0 %vm1770_vm2, %v1749_v48  ;;  %v1731_v58 = vmax.f32 %v1677_v51, 0.0 }
 0x37e   : > { %v1679_v54 = vpop.f32.mrf.mxu1  ;;  %3420 = vmatmul.mubr.msk.bf16.gmra.mxu0 %vm1770_vm2, %v1750_v49 }
 0x37f   : > { %v1680_v55 = vadd.f32 %v3973_v28, %v1679_v54  ;;  %v1734_v56 = vmax.f32 %v1688_v2, 0.0 }
 0x380   : > { %v3395_v57 = vpop.f32.mrf.mxu1 }
 0x381   : > { %v1732_v59 = vmax.f32 %v1680_v55, 0.0  ;;  %v1752_v63 = vpack.c.bf16 %v1734_v56, %v1733_v60  ;;  %v1701_v4 = vadd.f32 %v3395_v57, %v3973_v28 }
 0x382   : > { %v1692_v61 = vpop.f32.mrf.mxu1 }
 0x383   : > { %v1751_v62 = vpack.c.bf16 %v1732_v59, %v1731_v58  ;;  %v1693_v1 = vadd.f32 %v3973_v28, %v1692_v61  ;;  %v1737_v10 = vmax.f32 %v1701_v4, 0.0 }
 0x384   : > { %v3396_v0 = vpop.f32.mrf.mxu1 }
 0x385   : > { %v1704_v3 = vadd.f32 %v3396_v0, %v3973_v28  ;;  %3423 = vmatprep.mubr.msk.bf16.mxu0 %vm1770_vm2, %v1751_v62  ;;  %v1735_v8 = vmax.f32 %v1693_v1, 0.0 }
 0x386   : > { %v1695_v5 = vpop.f32.mrf.mxu1  ;;  %3424 = vmatmul.mubr.msk.bf16.gmra.mxu0 %vm1770_vm2, %v1752_v63 }
 0x387   : > { %v1696_v6 = vadd.f32 %v3973_v28, %v1695_v5  ;;  %v1738_v7 = vmax.f32 %v1704_v3, 0.0  ;;  %v3590_v28 = vld [vmem:[%s4326_s13 + $0x8] sm:$0xff]  }
 0x388   : > { %3471 = vmatprep.subr.bf16.mxu0 %v3590_v28 }
 0x389   : > { %v1736_v9 = vmax.f32 %v1696_v6, 0.0  ;;  %v1754_v12 = vpack.c.bf16 %v1738_v7, %v1737_v10  ;;  %3472 = vmatpush3.bf16.msra.mxu0 %v3590_v28 }
 0x38a   : > { %3473 = vmatprep.subr.bf16.mxu0 %v3591_v15 }
 0x38b   : > { %v1753_v11 = vpack.c.bf16 %v1736_v9, %v1735_v8 }
 0x38d   : > { %3427 = vmatprep.mubr.msk.bf16.mxu0 %vm1770_vm2, %v1753_v11  ;;  %3474 = vmatpush3.bf16.msra.mxu0 %v3591_v15 }
 0x38e   : > { %3428 = vmatmul.mubr.msk.bf16.gmra.mxu0 %vm1770_vm2, %v1754_v12 }
 0x416   : > { %v3401_v16 = vpop.f32.mrf.mxu0 }
 0x417   : > { %v1862_v22 = vadd.f32 %v3401_v16, %v4038_v18 }
 0x418   : > { %v1853_v17 = vpop.f32.mrf.mxu0 }
 0x419   : > { %v1854_v20 = vadd.f32 %v4038_v18, %v1853_v17  ;;  %v1982_v29 = vmax.f32 %v1862_v22, 0.0 }
 0x41a   : > { %v3402_v19 = vpop.f32.mrf.mxu0 }
 0x41b   : > { %v1865_v21 = vadd.f32 %v3402_v19, %v4038_v18  ;;  %v1980_v26 = vmax.f32 %v1854_v20, 0.0 }
 0x41c   : > { %v1856_v23 = vpop.f32.mrf.mxu0 }
 0x41d   : > { %v1857_v24 = vadd.f32 %v4038_v18, %v1856_v23  ;;  %v1983_v40 = vmax.f32 %v1865_v21, 0.0 }
 0x41e   : > { %v3405_v25 = vpop.f32.mrf.mxu0 }
 0x41f   : > { %v1981_v27 = vmax.f32 %v1857_v24, 0.0  ;;  %v2013_v32 = vpack.c.bf16 %v1983_v40, %v1982_v29  ;;  %v1878_v36 = vadd.f32 %v3405_v25, %v4038_v18 }
 0x420   : > { %v1869_v30 = vpop.f32.mrf.mxu0 }
 0x421   : > { %v2012_v31 = vpack.c.bf16 %v1981_v27, %v1980_v26  ;;  %v1870_v34 = vadd.f32 %v4038_v18, %v1869_v30  ;;  %v1986_v43 = vmax.f32 %v1878_v36, 0.0 }
 0x422   : > { %v3406_v33 = vpop.f32.mrf.mxu0 }
 0x423   : > { %v1881_v35 = vadd.f32 %v3406_v33, %v4038_v18  ;;  %3435 = vmatprep.mubr.msk.bf16.mxu1 %vm1497_vm1, %v2012_v31  ;;  %v1984_v53 = vmax.f32 %v1870_v34, 0.0 }
 0x424   : > { %v1872_v37 = vpop.f32.mrf.mxu0  ;;  %3436 = vmatmul.mubr.msk.bf16.vlgmr.msra.gmra.mxu1 %vm1497_vm1, %v2013_v32 }
 0x425   : > { %v1873_v38 = vadd.f32 %v4038_v18, %v1872_v37  ;;  %v1987_v39 = vmax.f32 %v1881_v35, 0.0 }
 0x426   : > { %v3409_v41 = vpop.f32.mrf.mxu0 }
 0x427   : > { %v1985_v42 = vmax.f32 %v1873_v38, 0.0  ;;  %v2015_v46 = vpack.c.bf16 %v1987_v39, %v1986_v43  ;;  %v1894_v50 = vadd.f32 %v3409_v41, %v4038_v18 }
 0x428   : > { %v1885_v44 = vpop.f32.mrf.mxu0 }
 0x429   : > { %v2014_v45 = vpack.c.bf16 %v1985_v42, %v1984_v53  ;;  %v1886_v48 = vadd.f32 %v4038_v18, %v1885_v44  ;;  %v1990_v57 = vmax.f32 %v1894_v50, 0.0 }
 0x42a   : > { %v3410_v47 = vpop.f32.mrf.mxu0 }
 0x42b   : > { %v1897_v49 = vadd.f32 %v3410_v47, %v4038_v18  ;;  %3439 = vmatprep.mubr.msk.bf16.mxu1 %vm1497_vm1, %v2014_v45  ;;  %v1988_v55 = vmax.f32 %v1886_v48, 0.0 }
 0x42c   : > { %v1888_v51 = vpop.f32.mrf.mxu0  ;;  %3440 = vmatmul.mubr.msk.bf16.gmra.mxu1 %vm1497_vm1, %v2015_v46 }
 0x42d   : > { %v1889_v2 = vadd.f32 %v4038_v18, %v1888_v51  ;;  %v1991_v52 = vmax.f32 %v1897_v49, 0.0 }
 0x42e   : > { %v3413_v54 = vpop.f32.mrf.mxu0 }
 0x42f   : > { %v1989_v56 = vmax.f32 %v1889_v2, 0.0  ;;  %v2017_v60 = vpack.c.bf16 %v1991_v52, %v1990_v57  ;;  %v1910_v0 = vadd.f32 %v3413_v54, %v4038_v18 }
 0x430   : > { %v1901_v58 = vpop.f32.mrf.mxu0 }
 0x431   : > { %v2016_v59 = vpack.c.bf16 %v1989_v56, %v1988_v55  ;;  %v1902_v62 = vadd.f32 %v4038_v18, %v1901_v58  ;;  %v1994_v8 = vmax.f32 %v1910_v0, 0.0 }
 0x432   : > { %v3414_v61 = vpop.f32.mrf.mxu0 }
 0x433   : > { %v1913_v63 = vadd.f32 %v3414_v61, %v4038_v18  ;;  %3443 = vmatprep.mubr.msk.bf16.mxu1 %vm1497_vm1, %v2016_v59  ;;  %v1992_v6 = vmax.f32 %v1902_v62, 0.0 }
 0x434   : > { %v1904_v1 = vpop.f32.mrf.mxu0  ;;  %3444 = vmatmul.mubr.msk.bf16.gmra.mxu1 %vm1497_vm1, %v2017_v60 }
 0x435   : > { %v1905_v3 = vadd.f32 %v4038_v18, %v1904_v1  ;;  %v1995_v4 = vmax.f32 %v1913_v63, 0.0 }
 0x436   : > { %v3417_v5 = vpop.f32.mrf.mxu0 }
 0x437   : > { %v1993_v7 = vmax.f32 %v1905_v3, 0.0  ;;  %v2019_v11 = vpack.c.bf16 %v1995_v4, %v1994_v8  ;;  %v1926_v28 = vadd.f32 %v3417_v5, %v4038_v18  ;;  %v3592_v3 = vld [vmem:[%s4328_s15 + $0x38] sm:$0xff]   ;;  %v3593_v4 = vld [vmem:[%s4328_s15 + $0x30] sm:$0xff]   ;;  %v3595_v5 = vld [vmem:[%s4328_s15 + $0x20] sm:$0xff]  }
 0x438   : > { %v1917_v9 = vpop.f32.mrf.mxu0  ;;  %3507 = vmatprep.subr.bf16.mxu1 %v3592_v3  ;;  %v3598_v8 = vld [vmem:[%s4328_s15 + $0x8] sm:$0xff]  }
 0x439   : > { %v2018_v10 = vpack.c.bf16 %v1993_v7, %v1992_v6  ;;  %v1918_v13 = vadd.f32 %v4038_v18, %v1917_v9  ;;  %v1998_v22 = vmax.f32 %v1926_v28, 0.0  ;;  %3508 = vmatpush3.bf16.msra.mxu1 %v3592_v3  ;;  %v3596_v6 = vld [vmem:[%s4328_s15 + $0x18] sm:$0xff]   ;;  %v3597_v7 = vld [vmem:[%s4328_s15 + $0x10] sm:$0xff]  }
 0x43a   : > { %v3418_v12 = vpop.f32.mrf.mxu0  ;;  %3509 = vmatprep.subr.bf16.mxu1 %v3593_v4 }
 0x43b   : > { %v1929_v14 = vadd.f32 %v3418_v12, %v4038_v18  ;;  %3447 = vmatprep.mubr.msk.bf16.mxu1 %vm1497_vm1, %v2018_v10  ;;  %v1996_v20 = vmax.f32 %v1918_v13, 0.0 }
 0x43c   : > { %v1920_v15 = vpop.f32.mrf.mxu0  ;;  %3448 = vmatmul.mubr.msk.bf16.gmra.mxu1 %vm1497_vm1, %v2019_v11  ;;  %v4112_v11 = vld [vmem:[%s4325_s12] ss:$0 sm:$0xff] }
 0x43d   : > { %v1921_v16 = vadd.f32 %v4038_v18, %v1920_v15  ;;  %v1999_v17 = vmax.f32 %v1929_v14, 0.0  ;;  %3510 = vmatpush3.bf16.msra.mxu1 %v3593_v4 }
 0x43e   : > { %v3421_v19 = vpop.f32.mrf.mxu0 }
 0x43f   : > { %v1997_v21 = vmax.f32 %v1921_v16, 0.0  ;;  %v2021_v40 = vpack.c.bf16 %v1999_v17, %v1998_v22  ;;  %v1942_v29 = vadd.f32 %v3421_v19, %v4038_v18 }
 0x440   : > { %v1933_v23 = vpop.f32.mrf.mxu0 }
 0x441   : > { %v2020_v24 = vpack.c.bf16 %v1997_v21, %v1996_v20  ;;  %v1934_v26 = vadd.f32 %v4038_v18, %v1933_v23  ;;  %v2002_v36 = vmax.f32 %v1942_v29, 0.0 }
 0x442   : > { %v3422_v25 = vpop.f32.mrf.mxu0 }
 0x443   : > { %v1945_v27 = vadd.f32 %v3422_v25, %v4038_v18  ;;  %3451 = vmatprep.mubr.msk.bf16.mxu1 %vm1497_vm1, %v2020_v24  ;;  %v2000_v34 = vmax.f32 %v1934_v26, 0.0 }
 0x444   : > { %v1936_v30 = vpop.f32.mrf.mxu0  ;;  %3452 = vmatmul.mubr.msk.bf16.gmra.mxu1 %vm1497_vm1, %v2021_v40 }
 0x445   : > { %v1937_v31 = vadd.f32 %v4038_v18, %v1936_v30  ;;  %v2003_v32 = vmax.f32 %v1945_v27, 0.0 }
 0x446   : > { %v3425_v33 = vpop.f32.mrf.mxu0 }
 0x447   : > { %v2001_v35 = vmax.f32 %v1937_v31, 0.0  ;;  %v2023_v39 = vpack.c.bf16 %v2003_v32, %v2002_v36  ;;  %v1958_v43 = vadd.f32 %v3425_v33, %v4038_v18 }
 0x448   : > { %v1949_v37 = vpop.f32.mrf.mxu0 }
 0x449   : > { %v2022_v38 = vpack.c.bf16 %v2001_v35, %v2000_v34  ;;  %v1950_v53 = vadd.f32 %v4038_v18, %v1949_v37  ;;  %v2006_v50 = vmax.f32 %v1958_v43, 0.0 }
 0x44a   : > { %v3426_v41 = vpop.f32.mrf.mxu0 }
 0x44b   : > { %v1961_v42 = vadd.f32 %v3426_v41, %v4038_v18  ;;  %3455 = vmatprep.mubr.msk.bf16.mxu1 %vm1497_vm1, %v2022_v38  ;;  %v2004_v48 = vmax.f32 %v1950_v53, 0.0 }
 0x44c   : > { %v1952_v44 = vpop.f32.mrf.mxu0  ;;  %3456 = vmatmul.mubr.msk.bf16.gmra.mxu1 %vm1497_vm1, %v2023_v39 }
 0x44d   : > { %v1953_v45 = vadd.f32 %v4038_v18, %v1952_v44  ;;  %v2007_v46 = vmax.f32 %v1961_v42, 0.0 }
 0x44e   : > { %v3429_v47 = vpop.f32.mrf.mxu0 }
 0x44f   : > { %v2005_v49 = vmax.f32 %v1953_v45, 0.0  ;;  %v2025_v52 = vpack.c.bf16 %v2007_v46, %v2006_v50  ;;  %v1974_v57 = vadd.f32 %v3429_v47, %v4038_v18 }
 0x450   : > { %v1965_v51 = vpop.f32.mrf.mxu0 }
 0x451   : > { %v2024_v2 = vpack.c.bf16 %v2005_v49, %v2004_v48  ;;  %v1966_v55 = vadd.f32 %v4038_v18, %v1965_v51  ;;  %v2010_v63 = vmax.f32 %v1974_v57, 0.0 }
 0x452   : > { %v3430_v54 = vpop.f32.mrf.mxu0 }
 0x453   : > { %v1977_v56 = vadd.f32 %v3430_v54, %v4038_v18  ;;  %3459 = vmatprep.mubr.msk.bf16.mxu1 %vm1497_vm1, %v2024_v2  ;;  %v2008_v61 = vmax.f32 %v1966_v55, 0.0 }
 0x454   : > { %v1968_v58 = vpop.f32.mrf.mxu0  ;;  %3460 = vmatmul.mubr.msk.bf16.gmra.mxu1 %vm1497_vm1, %v2025_v52 }
 0x455   : > { %v1969_v59 = vadd.f32 %v4038_v18, %v1968_v58  ;;  %v2011_v60 = vmax.f32 %v1977_v56, 0.0  ;;  %v3594_v18 = vld [vmem:[%s4328_s15 + $0x28] sm:$0xff]  }
 0x456   : > { %3511 = vmatprep.subr.bf16.mxu1 %v3594_v18 }
 0x457   : > { %v2009_v62 = vmax.f32 %v1969_v59, 0.0  ;;  %v2027_v1 = vpack.c.bf16 %v2011_v60, %v2010_v63  ;;  %3512 = vmatpush3.bf16.msra.mxu1 %v3594_v18 }
 0x458   : > { %3513 = vmatprep.subr.bf16.mxu1 %v3595_v5 }
 0x459   : > { %v2026_v0 = vpack.c.bf16 %v2009_v62, %v2008_v61 }
 0x45b   : > { %3463 = vmatprep.mubr.msk.bf16.mxu1 %vm1497_vm1, %v2026_v0  ;;  %3514 = vmatpush3.bf16.msra.mxu1 %v3595_v5 }
 0x45c   : > { %3464 = vmatmul.mubr.msk.bf16.gmra.mxu1 %vm1497_vm1, %v2027_v1  ;;  %3515 = vmatprep.subr.bf16.mxu1 %v3596_v6 }
 0x45f   : > { %3516 = vmatpush3.bf16.msra.mxu1 %v3596_v6 }
 0x460   : > { %3517 = vmatprep.subr.bf16.mxu1 %v3597_v7 }
 0x463   : > { %3518 = vmatpush3.bf16.msra.mxu1 %v3597_v7 }
 0x464   : > { %3519 = vmatprep.subr.bf16.mxu1 %v3598_v8 }
 0x467   : > { %3520 = vmatpush3.bf16.msra.mxu1 %v3598_v8 }
 0x4e4   : > { %v3437_v9 = vpop.f32.mrf.mxu1 }
 0x4e5   : > { %v2142_v28 = vadd.f32 %v3437_v9, %v4112_v11 }
 0x4e6   : > { %v2133_v10 = vpop.f32.mrf.mxu1 }
 0x4e7   : > { %v2134_v13 = vadd.f32 %v4112_v11, %v2133_v10  ;;  %v2262_v22 = vmax.f32 %v2142_v28, 0.0 }
 0x4e8   : > { %v3438_v12 = vpop.f32.mrf.mxu1 }
 0x4e9   : > { %v2145_v14 = vadd.f32 %v3438_v12, %v4112_v11  ;;  %v2260_v20 = vmax.f32 %v2134_v13, 0.0 }
 0x4ea   : > { %v2136_v15 = vpop.f32.mrf.mxu1 }
 0x4eb   : > { %v2137_v16 = vadd.f32 %v4112_v11, %v2136_v15  ;;  %v2263_v17 = vmax.f32 %v2145_v14, 0.0 }
 0x4ec   : > { %v3441_v19 = vpop.f32.mrf.mxu1 }
 0x4ed   : > { %v2261_v21 = vmax.f32 %v2137_v16, 0.0  ;;  %v2293_v40 = vpack.c.bf16 %v2263_v17, %v2262_v22  ;;  %v2158_v29 = vadd.f32 %v3441_v19, %v4112_v11 }
 0x4ee   : > { %v2149_v23 = vpop.f32.mrf.mxu1 }
 0x4ef   : > { %v2292_v24 = vpack.c.bf16 %v2261_v21, %v2260_v20  ;;  %v2150_v26 = vadd.f32 %v4112_v11, %v2149_v23  ;;  %v2266_v36 = vmax.f32 %v2158_v29, 0.0 }
 0x4f0   : > { %v3442_v25 = vpop.f32.mrf.mxu1 }
 0x4f1   : > { %v2161_v27 = vadd.f32 %v3442_v25, %v4112_v11  ;;  %3475 = vmatprep.mubr.msk.bf16.mxu0 %vm640_vm0, %v2292_v24  ;;  %v2264_v34 = vmax.f32 %v2150_v26, 0.0 }
 0x4f2   : > { %v2152_v30 = vpop.f32.mrf.mxu1  ;;  %3476 = vmatmul.mubr.msk.bf16.vlgmr.msra.gmra.mxu0 %vm640_vm0, %v2293_v40 }
 0x4f3   : > { %v2153_v31 = vadd.f32 %v4112_v11, %v2152_v30  ;;  %v2267_v32 = vmax.f32 %v2161_v27, 0.0 }
 0x4f4   : > { %v3445_v33 = vpop.f32.mrf.mxu1 }
 0x4f5   : > { %v2265_v35 = vmax.f32 %v2153_v31, 0.0  ;;  %v2295_v39 = vpack.c.bf16 %v2267_v32, %v2266_v36  ;;  %v2174_v43 = vadd.f32 %v3445_v33, %v4112_v11 }
 0x4f6   : > { %v2165_v37 = vpop.f32.mrf.mxu1 }
 0x4f7   : > { %v2294_v38 = vpack.c.bf16 %v2265_v35, %v2264_v34  ;;  %v2166_v53 = vadd.f32 %v4112_v11, %v2165_v37  ;;  %v2270_v50 = vmax.f32 %v2174_v43, 0.0 }
 0x4f8   : > { %v3446_v41 = vpop.f32.mrf.mxu1 }
 0x4f9   : > { %v2177_v42 = vadd.f32 %v3446_v41, %v4112_v11  ;;  %3479 = vmatprep.mubr.msk.bf16.mxu0 %vm640_vm0, %v2294_v38  ;;  %v2268_v48 = vmax.f32 %v2166_v53, 0.0 }
 0x4fa   : > { %v2168_v44 = vpop.f32.mrf.mxu1  ;;  %3480 = vmatmul.mubr.msk.bf16.gmra.mxu0 %vm640_vm0, %v2295_v39 }
 0x4fb   : > { %v2169_v45 = vadd.f32 %v4112_v11, %v2168_v44  ;;  %v2271_v46 = vmax.f32 %v2177_v42, 0.0 }
 0x4fc   : > { %v3449_v47 = vpop.f32.mrf.mxu1 }
 0x4fd   : > { %v2269_v49 = vmax.f32 %v2169_v45, 0.0  ;;  %v2297_v52 = vpack.c.bf16 %v2271_v46, %v2270_v50  ;;  %v2190_v57 = vadd.f32 %v3449_v47, %v4112_v11 }
 0x4fe   : > { %v2181_v51 = vpop.f32.mrf.mxu1 }
 0x4ff   : > { %v2296_v2 = vpack.c.bf16 %v2269_v49, %v2268_v48  ;;  %v2182_v55 = vadd.f32 %v4112_v11, %v2181_v51  ;;  %v2274_v0 = vmax.f32 %v2190_v57, 0.0 }
 0x500   : > { %v3450_v54 = vpop.f32.mrf.mxu1 }
 0x501   : > { %v2193_v56 = vadd.f32 %v3450_v54, %v4112_v11  ;;  %3483 = vmatprep.mubr.msk.bf16.mxu0 %vm640_vm0, %v2296_v2  ;;  %v2272_v62 = vmax.f32 %v2182_v55, 0.0 }
 0x502   : > { %v2184_v58 = vpop.f32.mrf.mxu1  ;;  %3484 = vmatmul.mubr.msk.bf16.gmra.mxu0 %vm640_vm0, %v2297_v52 }
 0x503   : > { %v2185_v59 = vadd.f32 %v4112_v11, %v2184_v58  ;;  %v2275_v60 = vmax.f32 %v2193_v56, 0.0 }
 0x504   : > { %v3453_v61 = vpop.f32.mrf.mxu1 }
 0x505   : > { %v2273_v63 = vmax.f32 %v2185_v59, 0.0  ;;  %v2299_v4 = vpack.c.bf16 %v2275_v60, %v2274_v0  ;;  %v2206_v7 = vadd.f32 %v3453_v61, %v4112_v11  ;;  %v3599_v59 = vld [vmem:[%s4328_s15] sm:$0xff]  }
 0x506   : > { %v2197_v1 = vpop.f32.mrf.mxu1  ;;  %3521 = vmatprep.subr.bf16.mxu1 %v3599_v59 }
 0x507   : > { %v2298_v3 = vpack.c.bf16 %v2273_v63, %v2272_v62  ;;  %v2198_v5 = vadd.f32 %v4112_v11, %v2197_v1  ;;  %v2278_v28 = vmax.f32 %v2206_v7, 0.0  ;;  %3522 = vmatpush3.bf16.msra.mxu1 %v3599_v59 }
 0x508   : > { %v3454_v18 = vpop.f32.mrf.mxu1 }
 0x509   : > { %v2209_v6 = vadd.f32 %v3454_v18, %v4112_v11  ;;  %3487 = vmatprep.mubr.msk.bf16.mxu0 %vm640_vm0, %v2298_v3  ;;  %v2276_v13 = vmax.f32 %v2198_v5, 0.0 }
 0x50a   : > { %v2200_v8 = vpop.f32.mrf.mxu1  ;;  %3488 = vmatmul.mubr.msk.bf16.gmra.mxu0 %vm640_vm0, %v2299_v4 }
 0x50b   : > { %v2201_v9 = vadd.f32 %v4112_v11, %v2200_v8  ;;  %v2279_v10 = vmax.f32 %v2209_v6, 0.0 }
 0x50c   : > { %v3457_v12 = vpop.f32.mrf.mxu1 }
 0x50d   : > { %v2277_v14 = vmax.f32 %v2201_v9, 0.0  ;;  %v2301_v17 = vpack.c.bf16 %v2279_v10, %v2278_v28  ;;  %v2222_v22 = vadd.f32 %v3457_v12, %v4112_v11 }
 0x50e   : > { %v2213_v15 = vpop.f32.mrf.mxu1 }
 0x50f   : > { %v2300_v16 = vpack.c.bf16 %v2277_v14, %v2276_v13  ;;  %v2214_v20 = vadd.f32 %v4112_v11, %v2213_v15  ;;  %v2282_v29 = vmax.f32 %v2222_v22, 0.0 }
 0x510   : > { %v3458_v19 = vpop.f32.mrf.mxu1 }
 0x511   : > { %v2225_v21 = vadd.f32 %v3458_v19, %v4112_v11  ;;  %3491 = vmatprep.mubr.msk.bf16.mxu0 %vm640_vm0, %v2300_v16  ;;  %v2280_v26 = vmax.f32 %v2214_v20, 0.0 }
 0x512   : > { %v2216_v23 = vpop.f32.mrf.mxu1  ;;  %3492 = vmatmul.mubr.msk.bf16.gmra.mxu0 %vm640_vm0, %v2301_v17 }
 0x513   : > { %v2217_v24 = vadd.f32 %v4112_v11, %v2216_v23  ;;  %v2283_v40 = vmax.f32 %v2225_v21, 0.0 }
 0x514   : > { %v3461_v25 = vpop.f32.mrf.mxu1 }
 0x515   : > { %v2281_v27 = vmax.f32 %v2217_v24, 0.0  ;;  %v2303_v32 = vpack.c.bf16 %v2283_v40, %v2282_v29  ;;  %v2238_v36 = vadd.f32 %v3461_v25, %v4112_v11 }
 0x516   : > { %v2229_v30 = vpop.f32.mrf.mxu1 }
 0x517   : > { %v2302_v31 = vpack.c.bf16 %v2281_v27, %v2280_v26  ;;  %v2230_v34 = vadd.f32 %v4112_v11, %v2229_v30  ;;  %v2286_v43 = vmax.f32 %v2238_v36, 0.0 }
 0x518   : > { %v3462_v33 = vpop.f32.mrf.mxu1 }
 0x519   : > { %v2241_v35 = vadd.f32 %v3462_v33, %v4112_v11  ;;  %3495 = vmatprep.mubr.msk.bf16.mxu0 %vm640_vm0, %v2302_v31  ;;  %v2284_v53 = vmax.f32 %v2230_v34, 0.0 }
 0x51a   : > { %v2232_v37 = vpop.f32.mrf.mxu1  ;;  %3496 = vmatmul.mubr.msk.bf16.gmra.mxu0 %vm640_vm0, %v2303_v32 }
 0x51b   : > { %v2233_v38 = vadd.f32 %v4112_v11, %v2232_v37  ;;  %v2287_v39 = vmax.f32 %v2241_v35, 0.0 }
 0x51c   : > { %v3465_v41 = vpop.f32.mrf.mxu1 }
 0x51d   : > { %v2285_v42 = vmax.f32 %v2233_v38, 0.0  ;;  %v2305_v46 = vpack.c.bf16 %v2287_v39, %v2286_v43  ;;  %v2254_v50 = vadd.f32 %v3465_v41, %v4112_v11 }
 0x51e   : > { %v2245_v44 = vpop.f32.mrf.mxu1 }
 0x51f   : > { %v2304_v45 = vpack.c.bf16 %v2285_v42, %v2284_v53  ;;  %v2246_v48 = vadd.f32 %v4112_v11, %v2245_v44  ;;  %v2290_v56 = vmax.f32 %v2254_v50, 0.0 }
 0x520   : > { %v3466_v47 = vpop.f32.mrf.mxu1 }
 0x521   : > { %v2257_v49 = vadd.f32 %v3466_v47, %v4112_v11  ;;  %3499 = vmatprep.mubr.msk.bf16.mxu0 %vm640_vm0, %v2304_v45  ;;  %v2288_v54 = vmax.f32 %v2246_v48, 0.0 }
 0x522   : > { %v2248_v51 = vpop.f32.mrf.mxu1  ;;  %3500 = vmatmul.mubr.msk.bf16.gmra.mxu0 %vm640_vm0, %v2305_v46 }
 0x523   : > { %v2249_v2 = vadd.f32 %v4112_v11, %v2248_v51  ;;  %v2291_v52 = vmax.f32 %v2257_v49, 0.0  ;;  %v4168_v11 = vld [vmem:[%s4327_s14] ss:$0 sm:$0xff] }
 0x525   : > { %v2289_v55 = vmax.f32 %v2249_v2, 0.0  ;;  %v2307_v58 = vpack.c.bf16 %v2291_v52, %v2290_v56 }
 0x527   : > { %v2306_v57 = vpack.c.bf16 %v2289_v55, %v2288_v54 }
 0x529   : > { %3503 = vmatprep.mubr.msk.bf16.mxu0 %vm640_vm0, %v2306_v57 }
 0x52a   : > { %3504 = vmatmul.mubr.msk.bf16.gmra.mxu0 %vm640_vm0, %v2307_v58 }
 0x5b2   : > { %v3477_v60 = vpop.f32.mrf.mxu0 }
 0x5b3   : > { %v2438_v1 = vadd.f32 %v3477_v60, %v4168_v11 }
 0x5b4   : > { %v2429_v61 = vpop.f32.mrf.mxu0 }
 0x5b5   : > { %v2430_v63 = vadd.f32 %v4168_v11, %v2429_v61  ;;  %v2558_v8 = vmax.f32 %v2438_v1, 0.0 }
 0x5b6   : > { %v3478_v62 = vpop.f32.mrf.mxu0 }
 0x5b7   : > { %v2441_v0 = vadd.f32 %v3478_v62, %v4168_v11  ;;  %v2556_v6 = vmax.f32 %v2430_v63, 0.0 }
 0x5b8   : > { %v2432_v3 = vpop.f32.mrf.mxu0 }
 0x5b9   : > { %v2433_v4 = vadd.f32 %v4168_v11, %v2432_v3  ;;  %v2559_v18 = vmax.f32 %v2441_v0, 0.0 }
 0x5ba   : > { %v3481_v5 = vpop.f32.mrf.mxu0 }
 0x5bb   : > { %v2557_v7 = vmax.f32 %v2433_v4, 0.0  ;;  %v2589_v12 = vpack.c.bf16 %v2559_v18, %v2558_v8  ;;  %v2454_v15 = vadd.f32 %v3481_v5, %v4168_v11 }
 0x5bc   : > { %v2445_v9 = vpop.f32.mrf.mxu0 }
 0x5bd   : > { %v2588_v10 = vpack.c.bf16 %v2557_v7, %v2556_v6  ;;  %v2446_v14 = vadd.f32 %v4168_v11, %v2445_v9  ;;  %v2562_v23 = vmax.f32 %v2454_v15, 0.0 }
 0x5be   : > { %v3482_v13 = vpop.f32.mrf.mxu0 }
 0x5bf   : > { %v2457_v28 = vadd.f32 %v3482_v13, %v4168_v11  ;;  %3523 = vmatprep.mubr.bf16.mxu1 %v2588_v10  ;;  %v2560_v21 = vmax.f32 %v2446_v14, 0.0 }
 0x5c0   : > { %v2448_v16 = vpop.f32.mrf.mxu0  ;;  %3524 = vmatmul.mubr.bf16.vlgmr.msra.gmra.mxu1 %v2589_v12 }
 0x5c1   : > { %v2449_v17 = vadd.f32 %v4168_v11, %v2448_v16  ;;  %v2563_v19 = vmax.f32 %v2457_v28, 0.0 }
 0x5c2   : > { %v3485_v20 = vpop.f32.mrf.mxu0 }
 0x5c3   : > { %v2561_v22 = vmax.f32 %v2449_v17, 0.0  ;;  %v2591_v25 = vpack.c.bf16 %v2563_v19, %v2562_v23  ;;  %v2470_v30 = vadd.f32 %v3485_v20, %v4168_v11 }
 0x5c4   : > { %v2461_v24 = vpop.f32.mrf.mxu0 }
 0x5c5   : > { %v2590_v40 = vpack.c.bf16 %v2561_v22, %v2560_v21  ;;  %v2462_v27 = vadd.f32 %v4168_v11, %v2461_v24  ;;  %v2566_v37 = vmax.f32 %v2470_v30, 0.0 }
 0x5c6   : > { %v3486_v26 = vpop.f32.mrf.mxu0 }
 0x5c7   : > { %v2473_v29 = vadd.f32 %v3486_v26, %v4168_v11  ;;  %3527 = vmatprep.mubr.bf16.mxu1 %v2590_v40  ;;  %v2564_v35 = vmax.f32 %v2462_v27, 0.0 }
 0x5c8   : > { %v2464_v31 = vpop.f32.mrf.mxu0  ;;  %3528 = vmatmul.mubr.bf16.gmra.mxu1 %v2591_v25 }
 0x5c9   : > { %v2465_v32 = vadd.f32 %v4168_v11, %v2464_v31  ;;  %v2567_v33 = vmax.f32 %v2473_v29, 0.0 }
 0x5ca   : > { %v3489_v34 = vpop.f32.mrf.mxu0 }
 0x5cb   : > { %v2565_v36 = vmax.f32 %v2465_v32, 0.0  ;;  %v2593_v41 = vpack.c.bf16 %v2567_v33, %v2566_v37  ;;  %v2486_v44 = vadd.f32 %v3489_v34, %v4168_v11 }
 0x5cc   : > { %v2477_v38 = vpop.f32.mrf.mxu0 }
 0x5cd   : > { %v2592_v39 = vpack.c.bf16 %v2565_v36, %v2564_v35  ;;  %v2478_v42 = vadd.f32 %v4168_v11, %v2477_v38  ;;  %v2570_v51 = vmax.f32 %v2486_v44, 0.0 }
 0x5ce   : > { %v3490_v53 = vpop.f32.mrf.mxu0 }
 0x5cf   : > { %v2489_v43 = vadd.f32 %v3490_v53, %v4168_v11  ;;  %3531 = vmatprep.mubr.bf16.mxu1 %v2592_v39  ;;  %v2568_v49 = vmax.f32 %v2478_v42, 0.0 }
 0x5d0   : > { %v2480_v45 = vpop.f32.mrf.mxu0  ;;  %3532 = vmatmul.mubr.bf16.gmra.mxu1 %v2593_v41 }
 0x5d1   : > { %v2481_v46 = vadd.f32 %v4168_v11, %v2480_v45  ;;  %v2571_v47 = vmax.f32 %v2489_v43, 0.0 }
 0x5d2   : > { %v3493_v48 = vpop.f32.mrf.mxu0 }
 0x5d3   : > { %v2569_v50 = vmax.f32 %v2481_v46, 0.0  ;;  %v2595_v54 = vpack.c.bf16 %v2571_v47, %v2570_v51  ;;  %v2502_v58 = vadd.f32 %v3493_v48, %v4168_v11  ;;  %v4205_v46 = vld [vmem:[%s4329_s16] ss:$0 sm:$0xff] }
 0x5d4   : > { %v2493_v2 = vpop.f32.mrf.mxu0 }
 0x5d5   : > { %v2594_v52 = vpack.c.bf16 %v2569_v50, %v2568_v49  ;;  %v2494_v56 = vadd.f32 %v4168_v11, %v2493_v2  ;;  %v2574_v1 = vmax.f32 %v2502_v58, 0.0 }
 0x5d6   : > { %v3494_v55 = vpop.f32.mrf.mxu0 }
 0x5d7   : > { %v2505_v57 = vadd.f32 %v3494_v55, %v4168_v11  ;;  %3535 = vmatprep.mubr.bf16.mxu1 %v2594_v52  ;;  %v2572_v63 = vmax.f32 %v2494_v56, 0.0 }
 0x5d8   : > { %v2496_v59 = vpop.f32.mrf.mxu0  ;;  %3536 = vmatmul.mubr.bf16.gmra.mxu1 %v2595_v54 }
 0x5d9   : > { %v2497_v60 = vadd.f32 %v4168_v11, %v2496_v59  ;;  %v2575_v61 = vmax.f32 %v2505_v57, 0.0 }
 0x5da   : > { %v3497_v62 = vpop.f32.mrf.mxu0 }
 0x5db   : > { %v2573_v0 = vmax.f32 %v2497_v60, 0.0  ;;  %v2597_v18 = vpack.c.bf16 %v2575_v61, %v2574_v1  ;;  %v2518_v8 = vadd.f32 %v3497_v62, %v4168_v11 }
 0x5dc   : > { %v2509_v3 = vpop.f32.mrf.mxu0 }
 0x5dd   : > { %v2596_v4 = vpack.c.bf16 %v2573_v0, %v2572_v63  ;;  %v2510_v6 = vadd.f32 %v4168_v11, %v2509_v3  ;;  %v2578_v15 = vmax.f32 %v2518_v8, 0.0 }
 0x5de   : > { %v3498_v5 = vpop.f32.mrf.mxu0 }
 0x5df   : > { %v2521_v7 = vadd.f32 %v3498_v5, %v4168_v11  ;;  %3539 = vmatprep.mubr.bf16.mxu1 %v2596_v4  ;;  %v2576_v14 = vmax.f32 %v2510_v6, 0.0 }
 0x5e0   : > { %v2512_v9 = vpop.f32.mrf.mxu0  ;;  %3540 = vmatmul.mubr.bf16.gmra.mxu1 %v2597_v18 }
 0x5e1   : > { %v2513_v10 = vadd.f32 %v4168_v11, %v2512_v9  ;;  %v2579_v12 = vmax.f32 %v2521_v7, 0.0 }
 0x5e2   : > { %v3501_v13 = vpop.f32.mrf.mxu0 }
 0x5e3   : > { %v2577_v28 = vmax.f32 %v2513_v10, 0.0  ;;  %v2599_v19 = vpack.c.bf16 %v2579_v12, %v2578_v15  ;;  %v2534_v23 = vadd.f32 %v3501_v13, %v4168_v11 }
 0x5e4   : > { %v2525_v16 = vpop.f32.mrf.mxu0 }
 0x5e5   : > { %v2598_v17 = vpack.c.bf16 %v2577_v28, %v2576_v14  ;;  %v2526_v21 = vadd.f32 %v4168_v11, %v2525_v16  ;;  %v2582_v30 = vmax.f32 %v2534_v23, 0.0 }
 0x5e6   : > { %v3502_v20 = vpop.f32.mrf.mxu0 }
 0x5e7   : > { %v2537_v22 = vadd.f32 %v3502_v20, %v4168_v11  ;;  %3543 = vmatprep.mubr.bf16.mxu1 %v2598_v17  ;;  %v2580_v27 = vmax.f32 %v2526_v21, 0.0 }
 0x5e8   : > { %v2528_v24 = vpop.f32.mrf.mxu0  ;;  %3544 = vmatmul.mubr.bf16.gmra.mxu1 %v2599_v19 }
 0x5e9   : > { %v2529_v40 = vadd.f32 %v4168_v11, %v2528_v24  ;;  %v2583_v25 = vmax.f32 %v2537_v22, 0.0 }
 0x5ea   : > { %v3505_v26 = vpop.f32.mrf.mxu0 }
 0x5eb   : > { %v2581_v29 = vmax.f32 %v2529_v40, 0.0  ;;  %v2601_v33 = vpack.c.bf16 %v2583_v25, %v2582_v30  ;;  %v2550_v37 = vadd.f32 %v3505_v26, %v4168_v11 }
 0x5ec   : > { %v2541_v31 = vpop.f32.mrf.mxu0 }
 0x5ed   : > { %v2600_v32 = vpack.c.bf16 %v2581_v29, %v2580_v27  ;;  %v2542_v35 = vadd.f32 %v4168_v11, %v2541_v31  ;;  %v2586_v43 = vmax.f32 %v2550_v37, 0.0 }
 0x5ee   : > { %v3506_v34 = vpop.f32.mrf.mxu0 }
 0x5ef   : > { %v2553_v36 = vadd.f32 %v3506_v34, %v4168_v11  ;;  %3547 = vmatprep.mubr.bf16.mxu1 %v2600_v32  ;;  %v2584_v53 = vmax.f32 %v2542_v35, 0.0 }
 0x5f0   : > { %v2544_v38 = vpop.f32.mrf.mxu0  ;;  %3548 = vmatmul.mubr.bf16.gmra.mxu1 %v2601_v33 }
 0x5f1   : > { %v2545_v39 = vadd.f32 %v4168_v11, %v2544_v38  ;;  %v2587_v41 = vmax.f32 %v2553_v36, 0.0 }
 0x5f3   : > { %v2585_v42 = vmax.f32 %v2545_v39, 0.0  ;;  %v2603_v45 = vpack.c.bf16 %v2587_v41, %v2586_v43 }
 0x5f5   : > { %v2602_v44 = vpack.c.bf16 %v2585_v42, %v2584_v53 }
 0x5f7   : > { %3551 = vmatprep.mubr.bf16.mxu1 %v2602_v44 }
 0x5f8   : > { %3552 = vmatmul.mubr.bf16.gmra.mxu1 %v2603_v45 }
 0x680   : > { %v3525_v11 = vpop.f32.mrf.mxu1 }
 0x681   : > { %v2718_v47 = vadd.f32 %v3525_v11, %v4205_v46 }
 0x682   : > { %v2709_v48 = vpop.f32.mrf.mxu1 }
 0x683   : > { %2838 = vst.msk [vmem:[%s4212_s26 + $0x10] sm:$0xff] %vm640_vm0, %v2718_v47  ;;  %v2710_v49 = vadd.f32 %v4205_v46, %v2709_v48 }
 0x684   : > { %v3526_v50 = vpop.f32.mrf.mxu1 }
 0x685   : > { %2836 = vst.msk [vmem:[%s4212_s26] sm:$0xff] %vm640_vm0, %v2710_v49  ;;  %v2721_v51 = vadd.f32 %v3526_v50, %v4205_v46 }
 0x686   : > { %v2712_v2 = vpop.f32.mrf.mxu1 }
 0x687   : > { %2839 = vst.msk [vmem:[%s4212_s26 + $0x18] sm:$0xff] %vm640_vm0, %v2721_v51  ;;  %v2713_v52 = vadd.f32 %v4205_v46, %v2712_v2 }
 0x688   : > { %v3529_v54 = vpop.f32.mrf.mxu1 }
 0x689   : > { %2837 = vst.msk [vmem:[%s4212_s26 + $0x8] sm:$0xff] %vm640_vm0, %v2713_v52  ;;  %v2734_v55 = vadd.f32 %v3529_v54, %v4205_v46 }
 0x68a   : > { %v2725_v56 = vpop.f32.mrf.mxu1 }
 0x68b   : > { %2842 = vst.msk [vmem:[%s4212_s26 + $0x30] sm:$0xff] %vm640_vm0, %v2734_v55  ;;  %v2726_v57 = vadd.f32 %v4205_v46, %v2725_v56 }
 0x68c   : > { %v3530_v58 = vpop.f32.mrf.mxu1 }
 0x68d   : > { %2840 = vst.msk [vmem:[%s4212_s26 + $0x20] sm:$0xff] %vm640_vm0, %v2726_v57  ;;  %v2737_v59 = vadd.f32 %v3530_v58, %v4205_v46 }
 0x68e   : > { %v2728_v60 = vpop.f32.mrf.mxu1 }
 0x68f   : > { %2843 = vst.msk [vmem:[%s4212_s26 + $0x38] sm:$0xff] %vm640_vm0, %v2737_v59  ;;  %v2729_v61 = vadd.f32 %v4205_v46, %v2728_v60 }
 0x690   : > { %v3533_v62 = vpop.f32.mrf.mxu1 }
 0x691   : > { %2841 = vst.msk [vmem:[%s4212_s26 + $0x28] sm:$0xff] %vm640_vm0, %v2729_v61  ;;  %v2750_v63 = vadd.f32 %v3533_v62, %v4205_v46 }
 0x692   : > { %v2741_v0 = vpop.f32.mrf.mxu1 }
 0x693   : > { %2846 = vst.msk [vmem:[%s4212_s26 + $0x50] sm:$0xff] %vm640_vm0, %v2750_v63  ;;  %v2742_v1 = vadd.f32 %v4205_v46, %v2741_v0 }
 0x694   : > { %v3534_v3 = vpop.f32.mrf.mxu1 }
 0x695   : > { %2844 = vst.msk [vmem:[%s4212_s26 + $0x40] sm:$0xff] %vm640_vm0, %v2742_v1  ;;  %v2753_v4 = vadd.f32 %v3534_v3, %v4205_v46 }
 0x696   : > { %v2744_v18 = vpop.f32.mrf.mxu1 }
 0x697   : > { %2847 = vst.msk [vmem:[%s4212_s26 + $0x58] sm:$0xff] %vm640_vm0, %v2753_v4  ;;  %v2745_v5 = vadd.f32 %v4205_v46, %v2744_v18 }
 0x698   : > { %v3537_v6 = vpop.f32.mrf.mxu1 }
 0x699   : > { %2845 = vst.msk [vmem:[%s4212_s26 + $0x48] sm:$0xff] %vm640_vm0, %v2745_v5  ;;  %v2766_v7 = vadd.f32 %v3537_v6, %v4205_v46 }
 0x69a   : > { %v2757_v8 = vpop.f32.mrf.mxu1 }
 0x69b   : > { %2850 = vst.msk [vmem:[%s4212_s26 + $0x70] sm:$0xff] %vm640_vm0, %v2766_v7  ;;  %v2758_v9 = vadd.f32 %v4205_v46, %v2757_v8 }
 0x69c   : > { %v3538_v10 = vpop.f32.mrf.mxu1 }
 0x69d   : > { %2848 = vst.msk [vmem:[%s4212_s26 + $0x60] sm:$0xff] %vm640_vm0, %v2758_v9  ;;  %v2769_v12 = vadd.f32 %v3538_v10, %v4205_v46 }
 0x69e   : > { %v2760_v13 = vpop.f32.mrf.mxu1 }
 0x69f   : > { %2851 = vst.msk [vmem:[%s4212_s26 + $0x78] sm:$0xff] %vm640_vm0, %v2769_v12  ;;  %v2761_v14 = vadd.f32 %v4205_v46, %v2760_v13 }
 0x6a0   : > { %v3541_v28 = vpop.f32.mrf.mxu1 }
 0x6a1   : > { %2849 = vst.msk [vmem:[%s4212_s26 + $0x68] sm:$0xff] %vm640_vm0, %v2761_v14  ;;  %v2782_v15 = vadd.f32 %v3541_v28, %v4205_v46 }
 0x6a2   : > { %v2773_v16 = vpop.f32.mrf.mxu1 }
 0x6a3   : > { %2854 = vst.msk [vmem:[%s4212_s26 + $0x90] sm:$0xff] %vm640_vm0, %v2782_v15  ;;  %v2774_v17 = vadd.f32 %v4205_v46, %v2773_v16 }
 0x6a4   : > { %v3542_v19 = vpop.f32.mrf.mxu1 }
 0x6a5   : > { %2852 = vst.msk [vmem:[%s4212_s26 + $0x80] sm:$0xff] %vm640_vm0, %v2774_v17  ;;  %v2785_v20 = vadd.f32 %v3542_v19, %v4205_v46 }
 0x6a6   : > { %v2776_v21 = vpop.f32.mrf.mxu1 }
 0x6a7   : > { %2855 = vst.msk [vmem:[%s4212_s26 + $0x98] sm:$0xff] %vm640_vm0, %v2785_v20  ;;  %v2777_v22 = vadd.f32 %v4205_v46, %v2776_v21 }
 0x6a8   : > { %v3545_v23 = vpop.f32.mrf.mxu1 }
 0x6a9   : > { %2853 = vst.msk [vmem:[%s4212_s26 + $0x88] sm:$0xff] %vm640_vm0, %v2777_v22  ;;  %v2798_v24 = vadd.f32 %v3545_v23, %v4205_v46 }
 0x6aa   : > { %v2789_v40 = vpop.f32.mrf.mxu1 }
 0x6ab   : > { %2858 = vst.msk [vmem:[%s4212_s26 + $0xb0] sm:$0xff] %vm640_vm0, %v2798_v24  ;;  %v2790_v25 = vadd.f32 %v4205_v46, %v2789_v40 }
 0x6ac   : > { %v3546_v26 = vpop.f32.mrf.mxu1 }
 0x6ad   : > { %2856 = vst.msk [vmem:[%s4212_s26 + $0xa0] sm:$0xff] %vm640_vm0, %v2790_v25  ;;  %v2801_v27 = vadd.f32 %v3546_v26, %v4205_v46 }
 0x6ae   : > { %v2792_v29 = vpop.f32.mrf.mxu1 }
 0x6af   : > { %2859 = vst.msk [vmem:[%s4212_s26 + $0xb8] sm:$0xff] %vm640_vm0, %v2801_v27  ;;  %v2793_v30 = vadd.f32 %v4205_v46, %v2792_v29 }
 0x6b0   : > { %v3549_v31 = vpop.f32.mrf.mxu1 }
 0x6b1   : > { %2857 = vst.msk [vmem:[%s4212_s26 + $0xa8] sm:$0xff] %vm640_vm0, %v2793_v30  ;;  %v2814_v32 = vadd.f32 %v3549_v31, %v4205_v46 }
 0x6b2   : > { %v2805_v33 = vpop.f32.mrf.mxu1 }
 0x6b3   : > { %2862 = vst.msk [vmem:[%s4212_s26 + $0xd0] sm:$0xff] %vm640_vm0, %v2814_v32  ;;  %v2806_v34 = vadd.f32 %v4205_v46, %v2805_v33 }
 0x6b4   : > { %v3550_v35 = vpop.f32.mrf.mxu1 }
 0x6b5   : > { %2860 = vst.msk [vmem:[%s4212_s26 + $0xc0] sm:$0xff] %vm640_vm0, %v2806_v34  ;;  %v2817_v36 = vadd.f32 %v3550_v35, %v4205_v46 }
 0x6b6   : > { %v2808_v37 = vpop.f32.mrf.mxu1 }
 0x6b7   : > { %2863 = vst.msk [vmem:[%s4212_s26 + $0xd8] sm:$0xff] %vm640_vm0, %v2817_v36  ;;  %v2809_v38 = vadd.f32 %v4205_v46, %v2808_v37 }
 0x6b8   : > { %v3553_v39 = vpop.f32.mrf.mxu1 }
 0x6b9   : > { %2861 = vst.msk [vmem:[%s4212_s26 + $0xc8] sm:$0xff] %vm640_vm0, %v2809_v38  ;;  %v2830_v41 = vadd.f32 %v3553_v39, %v4205_v46 }
 0x6ba   : > { %v2821_v53 = vpop.f32.mrf.mxu1 }
 0x6bb   : > { %2866 = vst.msk [vmem:[%s4212_s26 + $0xf0] sm:$0xff] %vm640_vm0, %v2830_v41  ;;  %v2822_v42 = vadd.f32 %v4205_v46, %v2821_v53 }
 0x6bc   : > { %v3554_v43 = vpop.f32.mrf.mxu1 }
 0x6bd   : > { %2864 = vst.msk [vmem:[%s4212_s26 + $0xe0] sm:$0xff] %vm640_vm0, %v2822_v42  ;;  %v2833_v44 = vadd.f32 %v3554_v43, %v4205_v46 }
 0x6be   : > { %v2824_v45 = vpop.f32.mrf.mxu1 }
 0x6bf   : > { %2867 = vst.msk [vmem:[%s4212_s26 + $0xf8] sm:$0xff] %vm640_vm0, %v2833_v44  ;;  %v2825_v11 = vadd.f32 %v4205_v46, %v2824_v45 }
 0x6c1   : > { %2865 = vst.msk [vmem:[%s4212_s26 + $0xe8] sm:$0xff] %vm640_vm0, %v2825_v11 }
 0x6c2 PF: > { %s27_s24 = sadd.s32 1, %s3606_s24  }
 0x6c3   : > { %p24_p4 = scmp.ge.s32.totalorder %s27_s24, 4  }
 0x6c5   :  { %26 = sbr.rel (!%p24_p4) target bundleno = 3 (0x3), region = 118 }

</bundles_post_ra>
